<compile_context>
chip_gen: v6e
topology: v6e:2x2x1
jax: 0.10.0
libtpu: 0.0.40
codegen_flags: <defaults>
</compile_context>

<pallas_src>
import functools

import jax
import jax.numpy as jnp
from jax import lax
from jax.experimental import pallas as pl
from jax.experimental.pallas import tpu as pltpu


_BN_EPS = 1e-5
_BN_BIAS = 1e-4     # BatchNorm1d: weight=1, bias=1e-4 (set in module __init__)
_LANES = 128


def _round_up(v, m):
    return (v + m - 1) // m * m


def _slab_layout(num_features, hidden, layers, num_classes):
    """Static row layout of the packed [rows, lanes] f32 weight/bias slab."""
    layout = {}
    off = 0

    def add(name, nrows, ncols):
        nonlocal off
        layout[name] = (off, nrows, ncols)
        off += _round_up(nrows, 8)          # keep every block 8-sublane aligned

    add("W_feat", num_features, hidden)                  # conv_feat (gfn): no bias
    for l in range(layers):
        add(f"gin_W1_{l}", hidden, hidden)
        add(f"gin_W2_{l}", hidden, hidden)
    add("W_ea", 2 * hidden, 2)                           # edge_att_mlp
    add("W_na", hidden, 2)                               # node_att_mlp
    add("W_obj2", 2 * hidden, 2 * hidden)                # blockdiag(W_obj, W_obj)
    add("W1both", hidden, 2 * hidden)                    # [fc1_o | fc1_co]
    add("W2both", hidden, 2 * num_classes)               # [fc2_o | fc2_co]
    for l in range(layers):                              # biases, one row each
        add(f"gin_b1_{l}", 1, hidden)
        add(f"gin_b2_{l}", 1, hidden)
    add("b_ea", 1, 2)
    add("b_na", 1, 2)
    add("b_obj2", 1, 2 * hidden)
    add("b1both", 1, 2 * hidden)
    add("b2both", 1, 2 * num_classes)

    rows = _round_up(off, 8)
    max_nc = max(nc for _, _, nc in layout.values())
    width = _round_up(max(max_nc, _LANES), _LANES)
    return layout, rows, width


# --------------------------------- kernel ------------------------------------

def _causal_gin_kernel(idx_ref, x_ref, slab_ref, out_ref, *,
                       layout, n, e, g, hidden, layers, num_classes):
    f32 = jnp.float32
    H, C = hidden, num_classes

    def _bn(z):
        # BatchNorm1d, training-mode batch stats; single-pass var (f32, clamped).
        m = jnp.mean(z, axis=0, keepdims=True)
        m2 = jnp.mean(z * z, axis=0, keepdims=True)
        var = jnp.maximum(m2 - m * m, 0.0)
        return (z - m) * lax.rsqrt(var + _BN_EPS) + _BN_BIAS

    def _sigmoid(z):
        return 1.0 / (1.0 + jnp.exp(-z))

    def _log_softmax(z):
        z = z - jnp.max(z, axis=-1, keepdims=True)
        return z - jnp.log(jnp.sum(jnp.exp(z), axis=-1, keepdims=True))

    def dense(v, wname, bname=None):
        # Full-width slab GEMM (+ full-width bias row), then slice output cols.
        r0, nr, nc = layout[wname]
        out = jnp.dot(v, slab_ref[pl.ds(r0, nr), :], preferred_element_type=f32)
        if bname is not None:
            b0, _, _ = layout[bname]
            out = out + slab_ref[pl.ds(b0, 1), :]
        return out[:, :nc]

    def bias_row(bname):
        b0, _, nc = layout[bname]
        return slab_ref[pl.ds(b0, 1), :][:, :nc]

    dotT = functools.partial(lax.dot_general,
                             dimension_numbers=(((0,), (0,)), ((), ())),
                             preferred_element_type=f32)

    # ---- structural operators generated in-kernel from int32 indices ----------
    idx = idx_ref[...]                                              # [4, L] int32
    rc = jnp.concatenate([idx[0:1, :e], idx[1:2, :e]], axis=1)      # [1, 2E] row|col
    rcT = (lax.broadcasted_iota(jnp.int32, (n, 2 * e), 0) == rc).astype(f32)
    reT, ceT = rcT[:, :e], rcT[:, e:]          # [N,E]: reT[v,e]=1 iff row[e]==v
    poolT = (lax.broadcasted_iota(jnp.int32, (g, n), 0) == idx[2:3, :n]).astype(f32)
    pmT = (lax.broadcasted_iota(jnp.int32, (g, g), 0) == idx[3:4, :g]).astype(f32)

    x = x_ref[...].astype(f32)                                       # [N, F]

    # ---- bn_feat -> conv_feat (gfn: x @ W, no bias, no propagation) -> relu ---
    h = jnp.maximum(dense(_bn(x), "W_feat"), 0.0)                    # [N, H]

    # ---- GIN layers (eps=0): MLP(h + scatter_col(gather_row(h))) --------------
    for l in range(layers):
        msg = dotT(reT, h)                                           # [E, H] = h[row]
        agg = h + jnp.dot(ceT, msg, preferred_element_type=f32)      # [N, H]
        z = dense(agg, f"gin_W1_{l}", f"gin_b1_{l}")
        z = jnp.maximum(_bn(z), 0.0)
        h = jnp.maximum(dense(z, f"gin_W2_{l}", f"gin_b2_{l}"), 0.0)

    # ---- edge attention: one gather for [x[row]|x[col]], full W_ea, sigmoid ---
    hrc = dotT(rcT, h)                                               # [2E, H]
    edge_rep = jnp.concatenate([hrc[:e], hrc[e:]], axis=1)           # [E, 2H]
    ea = dense(edge_rep, "W_ea", "b_ea")                             # [E, 2]
    ew_c = _sigmoid(ea[:, 0:1] - ea[:, 1:2])       # exact softmax over width 2
    ew_o = 1.0 - ew_c

    # ---- node attention + causal / object branch split ------------------------
    na = dense(h, "W_na", "b_na")                                    # [N, 2]
    nw_c = _sigmoid(na[:, 0:1] - na[:, 1:2])
    nw_o = 1.0 - nw_c
    xc = nw_c * h
    xo = nw_o * h

    # ---- objects_convs: shared weight, both branches column-stacked -----------
    xbn2 = jnp.concatenate([_bn(xc), _bn(xo)], axis=1)               # [N, 2H]
    hco = dense(xbn2, "W_obj2")                     # [N, 2H]; bias after prop

    # GCN normalization (custom GCNConv.norm: degree = scatter_add(ew, row) + 1
    # from the added self-loop, so deg >= 1 and no zero-guard is needed).
    ew2 = jnp.concatenate([ew_c, ew_o], axis=1)                      # [E, 2]
    dinv = lax.rsqrt(1.0 + jnp.dot(reT, ew2, preferred_element_type=f32))   # [N, 2]
    dinv2 = jnp.concatenate([jnp.broadcast_to(dinv[:, 0:1], (n, H)),
                             jnp.broadcast_to(dinv[:, 1:2], (n, H))], axis=1)
    eww = jnp.concatenate([jnp.broadcast_to(ew_c, (e, H)),
                           jnp.broadcast_to(ew_o, (e, H))], axis=1)  # [E, 2H]
    msg = dotT(reT, dinv2 * hco)                                     # [E, 2H] gather
    agg = jnp.dot(ceT, eww * msg, preferred_element_type=f32)        # [N, 2H] scatter
    x2 = jnp.maximum(dinv2 * agg + dinv2 * dinv2 * hco + bias_row("b_obj2"), 0.0)

    # ---- global_add_pool, both branches in one GEMM ----------------------------
    pooled = jnp.dot(poolT, x2, preferred_element_type=f32)          # [G, 2H]
    xc_p, xo_p = pooled[:, :H], pooled[:, H:]

    # random_readout shuffle (cat_or_add == 'add'): xc_p[perm] + xo_p
    xco = dotT(pmT, xc_p) + xo_p

    # ---- all three readout heads as TWO stacked GEMMs (per-call BN stats) -----
    r_in = jnp.concatenate([_bn(xc_p), _bn(xo_p), _bn(xco)], axis=0)  # [3G, H]
    z = dense(r_in, "W1both", "b1both")                               # [3G, 2H]
    z1 = jnp.maximum(
        jnp.concatenate([z[:2 * g, :H], z[2 * g:, H:]], axis=0), 0.0)  # [3G, H]
    z1 = jnp.concatenate([_bn(z1[:g]), _bn(z1[g:2 * g]), _bn(z1[2 * g:])], axis=0)
    z2 = dense(z1, "W2both", "b2both")                                # [3G, 2C]
    logits = jnp.concatenate([z2[:2 * g, :C], z2[2 * g:, C:]], axis=0)  # [3G, C]
    out_ref[...] = _log_softmax(logits).astype(out_ref.dtype)


# ------------------------------- JAX wrapper ---------------------------------

def _full_spec(shape):
    zero = (0,) * len(shape)
    return pl.BlockSpec(shape, lambda i, _z=zero: _z)


def causal_gin_forward(params, x, edge_index, batch, num_graphs, *,
                       hidden, layers, num_classes, eval_random=True):
    n, num_features = x.shape
    e = edge_index.shape[1]
    g = num_graphs
    f32 = jnp.float32

    layout, rows, width = _slab_layout(num_features, hidden, layers, num_classes)

    # ---- pack every weight / bias into ONE lane-aligned f32 slab --------------
    blocks = {"W_feat": params["W_feat"],
              "W_ea": params["W_ea"],
              "W_na": params["W_na"],
              "b_ea": params["b_ea"][None, :],
              "b_na": params["b_na"][None, :]}
    for l in range(layers):
        blocks[f"gin_W1_{l}"] = params["gin_W1"][l]
        blocks[f"gin_W2_{l}"] = params["gin_W2"][l]
        blocks[f"gin_b1_{l}"] = params["gin_b1"][l][None, :]
        blocks[f"gin_b2_{l}"] = params["gin_b2"][l][None, :]
    wobj2 = jnp.zeros((2 * hidden, 2 * hidden), f32)
    wobj2 = wobj2.at[:hidden, :hidden].set(params["W_obj"])
    wobj2 = wobj2.at[hidden:, hidden:].set(params["W_obj"])
    blocks["W_obj2"] = wobj2
    blocks["W1both"] = jnp.concatenate([params["W_fc1_o"], params["W_fc1_co"]], axis=1)
    blocks["W2both"] = jnp.concatenate([params["W_fc2_o"], params["W_fc2_co"]], axis=1)
    blocks["b_obj2"] = jnp.concatenate([params["b_obj"], params["b_obj"]])[None, :]
    blocks["b1both"] = jnp.concatenate([params["b_fc1_o"], params["b_fc1_co"]])[None, :]
    blocks["b2both"] = jnp.concatenate([params["b_fc2_o"], params["b_fc2_co"]])[None, :]

    slab = jnp.zeros((rows, width), f32)
    for name, arr in blocks.items():
        r0, nr, nc = layout[name]
        slab = slab.at[r0:r0 + nr, :nc].set(jnp.asarray(arr, f32).reshape(nr, nc))

    # ---- int32 index block: row | col | batch | perm ---------------------------
    if eval_random:
        perm = jax.random.permutation(jax.random.PRNGKey(1), g)
    else:
        perm = jnp.arange(g)
    big_l = max(e, n, g)
    idx = jnp.zeros((4, big_l), jnp.int32)
    idx = idx.at[0, :e].set(edge_index[0].astype(jnp.int32))
    idx = idx.at[1, :e].set(edge_index[1].astype(jnp.int32))
    idx = idx.at[2, :n].set(batch.astype(jnp.int32))
    idx = idx.at[3, :g].set(perm.astype(jnp.int32))

    inputs = (idx, x.astype(f32), slab)

    in_bytes = sum(int(a.size) * a.dtype.itemsize for a in inputs)
    out_bytes = 3 * g * num_classes * 4
    vmem_limit = int(2 * in_bytes + out_bytes + (8 << 20))   # dbl-buffer + headroom

    kern = functools.partial(
        _causal_gin_kernel, layout=layout, n=n, e=e, g=g,
        hidden=hidden, layers=layers, num_classes=num_classes)

    out = pl.pallas_call(
        kern,
        out_shape=jax.ShapeDtypeStruct((3 * g, num_classes), f32),
        grid=(1,),
        in_specs=[_full_spec(a.shape) for a in inputs],
        out_specs=_full_spec((3 * g, num_classes)),
        compiler_params=pltpu.CompilerParams(
            dimension_semantics=("arbitrary",),
            vmem_limit_bytes=vmem_limit),
    )(*inputs)

    return out[:g], out[g:2 * g], out[2 * g:]      # xc_logis, xo_logis, xco_logis


def init_params(key, num_features, num_classes, hidden, layers):
    ki = iter(jax.random.split(key, 64))

    def nrm(shape, scale):
        return (scale * jax.random.normal(next(ki), shape)).astype(jnp.float32)

    p = {}
    p["W_feat"] = nrm((num_features, hidden), num_features ** -0.5)  # gfn GCNConv
    p["gin_W1"] = jnp.stack([nrm((hidden, hidden), hidden ** -0.5) for _ in range(layers)])
    p["gin_b1"] = jnp.stack([nrm((hidden,), 0.1) for _ in range(layers)])
    p["gin_W2"] = jnp.stack([nrm((hidden, hidden), hidden ** -0.5) for _ in range(layers)])
    p["gin_b2"] = jnp.stack([nrm((hidden,), 0.1) for _ in range(layers)])
    p["W_ea"], p["b_ea"] = nrm((2 * hidden, 2), (2 * hidden) ** -0.5), nrm((2,), 0.1)
    p["W_na"], p["b_na"] = nrm((hidden, 2), hidden ** -0.5), nrm((2,), 0.1)
    p["W_obj"], p["b_obj"] = nrm((hidden, hidden), hidden ** -0.5), nrm((hidden,), 0.1)
    p["W_fc1_o"], p["b_fc1_o"] = nrm((hidden, hidden), hidden ** -0.5), nrm((hidden,), 0.1)
    p["W_fc2_o"], p["b_fc2_o"] = nrm((hidden, num_classes), hidden ** -0.5), nrm((num_classes,), 0.1)
    p["W_fc1_co"], p["b_fc1_co"] = nrm((hidden, hidden), hidden ** -0.5), nrm((hidden,), 0.1)
    p["W_fc2_co"], p["b_fc2_co"] = nrm((hidden, num_classes), hidden ** -0.5), nrm((num_classes,), 0.1)
    return p


# ----------------------------------- main ------------------------------------

if __name__ == "__main__":
    num_features, num_classes = 8, 3
    hidden, layers = 32, 2                # args.hidden=32, args.layers=2, 'add'
    nodes_per_graph, num_graphs = 12, 2
    n = nodes_per_graph * num_graphs

    key = jax.random.PRNGKey(0)
    kx, kp = jax.random.split(key)
    x = jax.random.normal(kx, (n, num_features), jnp.float32)

    # two ring graphs, symmetric directed edges, no self-loops
    src, dst = [], []
    for gidx in range(num_graphs):
        off = gidx * nodes_per_graph
        for i in range(nodes_per_graph):
            j = (i + 1) % nodes_per_graph
            src += [off + i, off + j]
            dst += [off + j, off + i]
    edge_index = jnp.array([src, dst], dtype=jnp.int32)      # [2, E], E = 48
    batch = jnp.repeat(jnp.arange(num_graphs, dtype=jnp.int32), nodes_per_graph)

    params = init_params(kp, num_features, num_classes, hidden, layers)

    xc_logis, xo_logis, xco_logis = causal_gin_forward(
        params, x, edge_index, batch, num_graphs,
        hidden=hidden, layers=layers, num_classes=num_classes, eval_random=True)
    jax.block_until_ready((xc_logis, xo_logis, xco_logis))

    assert xc_logis.shape == (num_graphs, num_classes)
    assert xo_logis.shape == (num_graphs, num_classes)
    assert xco_logis.shape == (num_graphs, num_classes)
    assert bool(jnp.all(jnp.isfinite(xc_logis)))
    assert bool(jnp.all(jnp.isfinite(xo_logis)))
    assert bool(jnp.all(jnp.isfinite(xco_logis)))
    print("KERNEL_OK")
</pallas_src>

<mosaic_0001>
module attributes {stable_mosaic.version = 11 : i64} {
  func.func @_causal_gin_kernel(%arg0: i32, %arg1: memref<4x48xi32, #tpu.memory_space<vmem>>, %arg2: memref<24x8xf32, #tpu.memory_space<vmem>>, %arg3: memref<432x128xf32, #tpu.memory_space<vmem>>, %arg4: memref<6x3xf32, #tpu.memory_space<vmem>>) attributes {dimension_semantics = [#tpu.dimension_semantics<arbitrary>], iteration_bounds = array<i64: 1>, scalar_prefetch = 0 : i64, scratch_operands = 0 : i64, tpu.core_type = #tpu.core_type<tc>, window_params = [{pipeline_mode = #tpu.pipeline_mode<synchronous>, transform_indices = @transform_0, window_bounds = array<i64: 4, 48>}, {pipeline_mode = #tpu.pipeline_mode<synchronous>, transform_indices = @transform_1, window_bounds = array<i64: 24, 8>}, {pipeline_mode = #tpu.pipeline_mode<synchronous>, transform_indices = @transform_2, window_bounds = array<i64: 432, 128>}, {pipeline_mode = #tpu.pipeline_mode<synchronous>, transform_indices = @transform_3, window_bounds = array<i64: 6, 3>}]} {
    %c0 = arith.constant 0 : index
    %c0_0 = arith.constant 0 : index
    %0 = vector.load %arg1[%c0, %c0_0] : memref<4x48xi32, #tpu.memory_space<vmem>>, vector<4x48xi32>
    %1 = vector.extract_strided_slice %0 {offsets = [0, 0], sizes = [1, 48], strides = [1, 1]} : vector<4x48xi32> to vector<1x48xi32>
    %2 = vector.extract_strided_slice %0 {offsets = [1, 0], sizes = [1, 48], strides = [1, 1]} : vector<4x48xi32> to vector<1x48xi32>
    %3 = tpu.concatenate %1, %2 in 1 : vector<1x48xi32>, vector<1x48xi32> -> vector<1x96xi32>
    %4 = tpu.iota {dimensions = array<i32: 0>} : vector<24x96xi32>
    %5 = vector.broadcast %3 : vector<1x96xi32> to vector<24x96xi32>
    %6 = arith.cmpi eq, %4, %5 : vector<24x96xi32>
    %7 = arith.extui %6 : vector<24x96xi1> to vector<24x96xi32>
    %8 = arith.sitofp %7 : vector<24x96xi32> to vector<24x96xf32>
    %9 = vector.extract_strided_slice %8 {offsets = [0, 0], sizes = [24, 48], strides = [1, 1]} : vector<24x96xf32> to vector<24x48xf32>
    %10 = vector.extract_strided_slice %8 {offsets = [0, 48], sizes = [24, 48], strides = [1, 1]} : vector<24x96xf32> to vector<24x48xf32>
    %11 = tpu.iota {dimensions = array<i32: 0>} : vector<2x24xi32>
    %12 = vector.extract_strided_slice %0 {offsets = [2, 0], sizes = [1, 24], strides = [1, 1]} : vector<4x48xi32> to vector<1x24xi32>
    %13 = vector.broadcast %12 : vector<1x24xi32> to vector<2x24xi32>
    %14 = arith.cmpi eq, %11, %13 : vector<2x24xi32>
    %15 = arith.extui %14 : vector<2x24xi1> to vector<2x24xi32>
    %16 = arith.sitofp %15 : vector<2x24xi32> to vector<2x24xf32>
    %17 = tpu.iota {dimensions = array<i32: 0>} : vector<2x2xi32>
    %18 = vector.extract_strided_slice %0 {offsets = [3, 0], sizes = [1, 2], strides = [1, 1]} : vector<4x48xi32> to vector<1x2xi32>
    %19 = vector.broadcast %18 : vector<1x2xi32> to vector<2x2xi32>
    %20 = arith.cmpi eq, %17, %19 : vector<2x2xi32>
    %21 = arith.extui %20 : vector<2x2xi1> to vector<2x2xi32>
    %22 = arith.sitofp %21 : vector<2x2xi32> to vector<2x2xf32>
    %c0_1 = arith.constant 0 : index
    %c0_2 = arith.constant 0 : index
    %23 = vector.load %arg2[%c0_1, %c0_2] : memref<24x8xf32, #tpu.memory_space<vmem>>, vector<24x8xf32>
    %cst = arith.constant dense<0.000000e+00> : vector<8xf32>
    %24 = vector.multi_reduction <add>, %23, %cst [0] : vector<24x8xf32> to vector<8xf32>
    %25 = vector.shape_cast %24 : vector<8xf32> to vector<1x8xf32>
    %cst_3 = arith.constant 2.400000e+01 : f32
    %26 = vector.broadcast %cst_3 : f32 to vector<1x8xf32>
    %27 = arith.divf %25, %26 : vector<1x8xf32>
    %28 = arith.mulf %23, %23 : vector<24x8xf32>
    %cst_4 = arith.constant dense<0.000000e+00> : vector<8xf32>
    %29 = vector.multi_reduction <add>, %28, %cst_4 [0] : vector<24x8xf32> to vector<8xf32>
    %30 = vector.shape_cast %29 : vector<8xf32> to vector<1x8xf32>
    %cst_5 = arith.constant 2.400000e+01 : f32
    %31 = vector.broadcast %cst_5 : f32 to vector<1x8xf32>
    %32 = arith.divf %30, %31 : vector<1x8xf32>
    %33 = arith.mulf %27, %27 : vector<1x8xf32>
    %34 = arith.subf %32, %33 : vector<1x8xf32>
    %cst_6 = arith.constant 0.000000e+00 : f32
    %35 = vector.broadcast %cst_6 : f32 to vector<1x8xf32>
    %36 = arith.maximumf %34, %35 : vector<1x8xf32>
    %37 = vector.broadcast %27 : vector<1x8xf32> to vector<24x8xf32>
    %38 = arith.subf %23, %37 : vector<24x8xf32>
    %cst_7 = arith.constant 9.99999974E-6 : f32
    %39 = vector.broadcast %cst_7 : f32 to vector<1x8xf32>
    %40 = arith.addf %36, %39 : vector<1x8xf32>
    %41 = math.rsqrt %40 : vector<1x8xf32>
    %42 = vector.broadcast %41 : vector<1x8xf32> to vector<24x8xf32>
    %43 = arith.mulf %38, %42 : vector<24x8xf32>
    %cst_8 = arith.constant 9.99999974E-5 : f32
    %44 = vector.broadcast %cst_8 : f32 to vector<24x8xf32>
    %45 = arith.addf %43, %44 : vector<24x8xf32>
    %c0_9 = arith.constant 0 : index
    %c0_10 = arith.constant 0 : index
    %46 = vector.load %arg3[%c0_9, %c0_10] : memref<432x128xf32, #tpu.memory_space<vmem>>, vector<8x128xf32>
    %cst_11 = arith.constant dense<0.000000e+00> : vector<24x128xf32>
    %47 = tpu.matmul %45, %46, %cst_11 {dimension_numbers = #tpu.dot_dimension_numbers<[1], [0], [0], [1], [0, 0, 1, 1], [], []>} : vector<24x8xf32>, vector<8x128xf32>, vector<24x128xf32> -> vector<24x128xf32>
    %48 = vector.extract_strided_slice %47 {offsets = [0, 0], sizes = [24, 32], strides = [1, 1]} : vector<24x128xf32> to vector<24x32xf32>
    %cst_12 = arith.constant 0.000000e+00 : f32
    %49 = vector.broadcast %cst_12 : f32 to vector<24x32xf32>
    %50 = arith.maximumf %48, %49 : vector<24x32xf32>
    %cst_13 = arith.constant dense<0.000000e+00> : vector<48x32xf32>
    %51 = tpu.matmul %9, %50, %cst_13 {dimension_numbers = #tpu.dot_dimension_numbers<[0], [0], [1], [1], [0, 1, 1, 1], [], []>} : vector<24x48xf32>, vector<24x32xf32>, vector<48x32xf32> -> vector<48x32xf32>
    %cst_14 = arith.constant dense<0.000000e+00> : vector<24x32xf32>
    %52 = tpu.matmul %10, %51, %cst_14 {dimension_numbers = #tpu.dot_dimension_numbers<[1], [0], [0], [1], [0, 0, 1, 1], [], []>} : vector<24x48xf32>, vector<48x32xf32>, vector<24x32xf32> -> vector<24x32xf32>
    %53 = arith.addf %50, %52 : vector<24x32xf32>
    %c8 = arith.constant 8 : index
    %c0_15 = arith.constant 0 : index
    %54 = vector.load %arg3[%c8, %c0_15] : memref<432x128xf32, #tpu.memory_space<vmem>>, vector<32x128xf32>
    %cst_16 = arith.constant dense<0.000000e+00> : vector<24x128xf32>
    %55 = tpu.matmul %53, %54, %cst_16 {dimension_numbers = #tpu.dot_dimension_numbers<[1], [0], [0], [1], [0, 0, 1, 1], [], []>} : vector<24x32xf32>, vector<32x128xf32>, vector<24x128xf32> -> vector<24x128xf32>
    %c360 = arith.constant 360 : index
    %c0_17 = arith.constant 0 : index
    %56 = vector.load %arg3[%c360, %c0_17] : memref<432x128xf32, #tpu.memory_space<vmem>>, vector<1x128xf32>
    %57 = vector.broadcast %56 : vector<1x128xf32> to vector<24x128xf32>
    %58 = arith.addf %55, %57 : vector<24x128xf32>
    %59 = vector.extract_strided_slice %58 {offsets = [0, 0], sizes = [24, 32], strides = [1, 1]} : vector<24x128xf32> to vector<24x32xf32>
    %cst_18 = arith.constant dense<0.000000e+00> : vector<32xf32>
    %60 = vector.multi_reduction <add>, %59, %cst_18 [0] : vector<24x32xf32> to vector<32xf32>
    %61 = vector.shape_cast %60 : vector<32xf32> to vector<1x32xf32>
    %cst_19 = arith.constant 2.400000e+01 : f32
    %62 = vector.broadcast %cst_19 : f32 to vector<1x32xf32>
    %63 = arith.divf %61, %62 : vector<1x32xf32>
    %64 = arith.mulf %59, %59 : vector<24x32xf32>
    %cst_20 = arith.constant dense<0.000000e+00> : vector<32xf32>
    %65 = vector.multi_reduction <add>, %64, %cst_20 [0] : vector<24x32xf32> to vector<32xf32>
    %66 = vector.shape_cast %65 : vector<32xf32> to vector<1x32xf32>
    %cst_21 = arith.constant 2.400000e+01 : f32
    %67 = vector.broadcast %cst_21 : f32 to vector<1x32xf32>
    %68 = arith.divf %66, %67 : vector<1x32xf32>
    %69 = arith.mulf %63, %63 : vector<1x32xf32>
    %70 = arith.subf %68, %69 : vector<1x32xf32>
    %cst_22 = arith.constant 0.000000e+00 : f32
    %71 = vector.broadcast %cst_22 : f32 to vector<1x32xf32>
    %72 = arith.maximumf %70, %71 : vector<1x32xf32>
    %73 = vector.broadcast %63 : vector<1x32xf32> to vector<24x32xf32>
    %74 = arith.subf %59, %73 : vector<24x32xf32>
    %cst_23 = arith.constant 9.99999974E-6 : f32
    %75 = vector.broadcast %cst_23 : f32 to vector<1x32xf32>
    %76 = arith.addf %72, %75 : vector<1x32xf32>
    %77 = math.rsqrt %76 : vector<1x32xf32>
    %78 = vector.broadcast %77 : vector<1x32xf32> to vector<24x32xf32>
    %79 = arith.mulf %74, %78 : vector<24x32xf32>
    %cst_24 = arith.constant 9.99999974E-5 : f32
    %80 = vector.broadcast %cst_24 : f32 to vector<24x32xf32>
    %81 = arith.addf %79, %80 : vector<24x32xf32>
    %cst_25 = arith.constant 0.000000e+00 : f32
    %82 = vector.broadcast %cst_25 : f32 to vector<24x32xf32>
    %83 = arith.maximumf %81, %82 : vector<24x32xf32>
    %c40 = arith.constant 40 : index
    %c0_26 = arith.constant 0 : index
    %84 = vector.load %arg3[%c40, %c0_26] : memref<432x128xf32, #tpu.memory_space<vmem>>, vector<32x128xf32>
    %cst_27 = arith.constant dense<0.000000e+00> : vector<24x128xf32>
    %85 = tpu.matmul %83, %84, %cst_27 {dimension_numbers = #tpu.dot_dimension_numbers<[1], [0], [0], [1], [0, 0, 1, 1], [], []>} : vector<24x32xf32>, vector<32x128xf32>, vector<24x128xf32> -> vector<24x128xf32>
    %c368 = arith.constant 368 : index
    %c0_28 = arith.constant 0 : index
    %86 = vector.load %arg3[%c368, %c0_28] : memref<432x128xf32, #tpu.memory_space<vmem>>, vector<1x128xf32>
    %87 = vector.broadcast %86 : vector<1x128xf32> to vector<24x128xf32>
    %88 = arith.addf %85, %87 : vector<24x128xf32>
    %89 = vector.extract_strided_slice %88 {offsets = [0, 0], sizes = [24, 32], strides = [1, 1]} : vector<24x128xf32> to vector<24x32xf32>
    %cst_29 = arith.constant 0.000000e+00 : f32
    %90 = vector.broadcast %cst_29 : f32 to vector<24x32xf32>
    %91 = arith.maximumf %89, %90 : vector<24x32xf32>
    %cst_30 = arith.constant dense<0.000000e+00> : vector<48x32xf32>
    %92 = tpu.matmul %9, %91, %cst_30 {dimension_numbers = #tpu.dot_dimension_numbers<[0], [0], [1], [1], [0, 1, 1, 1], [], []>} : vector<24x48xf32>, vector<24x32xf32>, vector<48x32xf32> -> vector<48x32xf32>
    %cst_31 = arith.constant dense<0.000000e+00> : vector<24x32xf32>
    %93 = tpu.matmul %10, %92, %cst_31 {dimension_numbers = #tpu.dot_dimension_numbers<[1], [0], [0], [1], [0, 0, 1, 1], [], []>} : vector<24x48xf32>, vector<48x32xf32>, vector<24x32xf32> -> vector<24x32xf32>
    %94 = arith.addf %91, %93 : vector<24x32xf32>
    %c72 = arith.constant 72 : index
    %c0_32 = arith.constant 0 : index
    %95 = vector.load %arg3[%c72, %c0_32] : memref<432x128xf32, #tpu.memory_space<vmem>>, vector<32x128xf32>
    %cst_33 = arith.constant dense<0.000000e+00> : vector<24x128xf32>
    %96 = tpu.matmul %94, %95, %cst_33 {dimension_numbers = #tpu.dot_dimension_numbers<[1], [0], [0], [1], [0, 0, 1, 1], [], []>} : vector<24x32xf32>, vector<32x128xf32>, vector<24x128xf32> -> vector<24x128xf32>
    %c376 = arith.constant 376 : index
    %c0_34 = arith.constant 0 : index
    %97 = vector.load %arg3[%c376, %c0_34] : memref<432x128xf32, #tpu.memory_space<vmem>>, vector<1x128xf32>
    %98 = vector.broadcast %97 : vector<1x128xf32> to vector<24x128xf32>
    %99 = arith.addf %96, %98 : vector<24x128xf32>
    %100 = vector.extract_strided_slice %99 {offsets = [0, 0], sizes = [24, 32], strides = [1, 1]} : vector<24x128xf32> to vector<24x32xf32>
    %cst_35 = arith.constant dense<0.000000e+00> : vector<32xf32>
    %101 = vector.multi_reduction <add>, %100, %cst_35 [0] : vector<24x32xf32> to vector<32xf32>
    %102 = vector.shape_cast %101 : vector<32xf32> to vector<1x32xf32>
    %cst_36 = arith.constant 2.400000e+01 : f32
    %103 = vector.broadcast %cst_36 : f32 to vector<1x32xf32>
    %104 = arith.divf %102, %103 : vector<1x32xf32>
    %105 = arith.mulf %100, %100 : vector<24x32xf32>
    %cst_37 = arith.constant dense<0.000000e+00> : vector<32xf32>
    %106 = vector.multi_reduction <add>, %105, %cst_37 [0] : vector<24x32xf32> to vector<32xf32>
    %107 = vector.shape_cast %106 : vector<32xf32> to vector<1x32xf32>
    %cst_38 = arith.constant 2.400000e+01 : f32
    %108 = vector.broadcast %cst_38 : f32 to vector<1x32xf32>
    %109 = arith.divf %107, %108 : vector<1x32xf32>
    %110 = arith.mulf %104, %104 : vector<1x32xf32>
    %111 = arith.subf %109, %110 : vector<1x32xf32>
    %cst_39 = arith.constant 0.000000e+00 : f32
    %112 = vector.broadcast %cst_39 : f32 to vector<1x32xf32>
    %113 = arith.maximumf %111, %112 : vector<1x32xf32>
    %114 = vector.broadcast %104 : vector<1x32xf32> to vector<24x32xf32>
    %115 = arith.subf %100, %114 : vector<24x32xf32>
    %cst_40 = arith.constant 9.99999974E-6 : f32
    %116 = vector.broadcast %cst_40 : f32 to vector<1x32xf32>
    %117 = arith.addf %113, %116 : vector<1x32xf32>
    %118 = math.rsqrt %117 : vector<1x32xf32>
    %119 = vector.broadcast %118 : vector<1x32xf32> to vector<24x32xf32>
    %120 = arith.mulf %115, %119 : vector<24x32xf32>
    %cst_41 = arith.constant 9.99999974E-5 : f32
    %121 = vector.broadcast %cst_41 : f32 to vector<24x32xf32>
    %122 = arith.addf %120, %121 : vector<24x32xf32>
    %cst_42 = arith.constant 0.000000e+00 : f32
    %123 = vector.broadcast %cst_42 : f32 to vector<24x32xf32>
    %124 = arith.maximumf %122, %123 : vector<24x32xf32>
    %c104 = arith.constant 104 : index
    %c0_43 = arith.constant 0 : index
    %125 = vector.load %arg3[%c104, %c0_43] : memref<432x128xf32, #tpu.memory_space<vmem>>, vector<32x128xf32>
    %cst_44 = arith.constant dense<0.000000e+00> : vector<24x128xf32>
    %126 = tpu.matmul %124, %125, %cst_44 {dimension_numbers = #tpu.dot_dimension_numbers<[1], [0], [0], [1], [0, 0, 1, 1], [], []>} : vector<24x32xf32>, vector<32x128xf32>, vector<24x128xf32> -> vector<24x128xf32>
    %c384 = arith.constant 384 : index
    %c0_45 = arith.constant 0 : index
    %127 = vector.load %arg3[%c384, %c0_45] : memref<432x128xf32, #tpu.memory_space<vmem>>, vector<1x128xf32>
    %128 = vector.broadcast %127 : vector<1x128xf32> to vector<24x128xf32>
    %129 = arith.addf %126, %128 : vector<24x128xf32>
    %130 = vector.extract_strided_slice %129 {offsets = [0, 0], sizes = [24, 32], strides = [1, 1]} : vector<24x128xf32> to vector<24x32xf32>
    %cst_46 = arith.constant 0.000000e+00 : f32
    %131 = vector.broadcast %cst_46 : f32 to vector<24x32xf32>
    %132 = arith.maximumf %130, %131 : vector<24x32xf32>
    %cst_47 = arith.constant dense<0.000000e+00> : vector<96x32xf32>
    %133 = tpu.matmul %8, %132, %cst_47 {dimension_numbers = #tpu.dot_dimension_numbers<[0], [0], [1], [1], [0, 1, 1, 1], [], []>} : vector<24x96xf32>, vector<24x32xf32>, vector<96x32xf32> -> vector<96x32xf32>
    %134 = vector.extract_strided_slice %133 {offsets = [0, 0], sizes = [48, 32], strides = [1, 1]} : vector<96x32xf32> to vector<48x32xf32>
    %135 = vector.extract_strided_slice %133 {offsets = [48, 0], sizes = [48, 32], strides = [1, 1]} : vector<96x32xf32> to vector<48x32xf32>
    %136 = tpu.concatenate %134, %135 in 1 : vector<48x32xf32>, vector<48x32xf32> -> vector<48x64xf32>
    %c136 = arith.constant 136 : index
    %c0_48 = arith.constant 0 : index
    %137 = vector.load %arg3[%c136, %c0_48] : memref<432x128xf32, #tpu.memory_space<vmem>>, vector<64x128xf32>
    %cst_49 = arith.constant dense<0.000000e+00> : vector<48x128xf32>
    %138 = tpu.matmul %136, %137, %cst_49 {dimension_numbers = #tpu.dot_dimension_numbers<[1], [0], [0], [1], [0, 0, 1, 1], [], []>} : vector<48x64xf32>, vector<64x128xf32>, vector<48x128xf32> -> vector<48x128xf32>
    %c392 = arith.constant 392 : index
    %c0_50 = arith.constant 0 : index
    %139 = vector.load %arg3[%c392, %c0_50] : memref<432x128xf32, #tpu.memory_space<vmem>>, vector<1x128xf32>
    %140 = vector.broadcast %139 : vector<1x128xf32> to vector<48x128xf32>
    %141 = arith.addf %138, %140 : vector<48x128xf32>
    %142 = vector.extract_strided_slice %141 {offsets = [0, 0], sizes = [48, 2], strides = [1, 1]} : vector<48x128xf32> to vector<48x2xf32>
    %143 = vector.extract_strided_slice %142 {offsets = [0, 0], sizes = [48, 1], strides = [1, 1]} : vector<48x2xf32> to vector<48x1xf32>
    %144 = vector.extract_strided_slice %142 {offsets = [0, 1], sizes = [48, 1], strides = [1, 1]} : vector<48x2xf32> to vector<48x1xf32>
    %145 = arith.subf %143, %144 : vector<48x1xf32>
    %cst_51 = arith.constant 0.000000e+00 : f32
    %146 = vector.broadcast %cst_51 : f32 to vector<48x1xf32>
    %147 = arith.subf %146, %145 : vector<48x1xf32>
    %148 = math.exp %147 : vector<48x1xf32>
    %cst_52 = arith.constant 1.000000e+00 : f32
    %149 = vector.broadcast %cst_52 : f32 to vector<48x1xf32>
    %150 = arith.addf %149, %148 : vector<48x1xf32>
    %cst_53 = arith.constant 1.000000e+00 : f32
    %151 = vector.broadcast %cst_53 : f32 to vector<48x1xf32>
    %152 = arith.divf %151, %150 : vector<48x1xf32>
    %cst_54 = arith.constant 1.000000e+00 : f32
    %153 = vector.broadcast %cst_54 : f32 to vector<48x1xf32>
    %154 = arith.subf %153, %152 : vector<48x1xf32>
    %c200 = arith.constant 200 : index
    %c0_55 = arith.constant 0 : index
    %155 = vector.load %arg3[%c200, %c0_55] : memref<432x128xf32, #tpu.memory_space<vmem>>, vector<32x128xf32>
    %cst_56 = arith.constant dense<0.000000e+00> : vector<24x128xf32>
    %156 = tpu.matmul %132, %155, %cst_56 {dimension_numbers = #tpu.dot_dimension_numbers<[1], [0], [0], [1], [0, 0, 1, 1], [], []>} : vector<24x32xf32>, vector<32x128xf32>, vector<24x128xf32> -> vector<24x128xf32>
    %c400 = arith.constant 400 : index
    %c0_57 = arith.constant 0 : index
    %157 = vector.load %arg3[%c400, %c0_57] : memref<432x128xf32, #tpu.memory_space<vmem>>, vector<1x128xf32>
    %158 = vector.broadcast %157 : vector<1x128xf32> to vector<24x128xf32>
    %159 = arith.addf %156, %158 : vector<24x128xf32>
    %160 = vector.extract_strided_slice %159 {offsets = [0, 0], sizes = [24, 2], strides = [1, 1]} : vector<24x128xf32> to vector<24x2xf32>
    %161 = vector.extract_strided_slice %160 {offsets = [0, 0], sizes = [24, 1], strides = [1, 1]} : vector<24x2xf32> to vector<24x1xf32>
    %162 = vector.extract_strided_slice %160 {offsets = [0, 1], sizes = [24, 1], strides = [1, 1]} : vector<24x2xf32> to vector<24x1xf32>
    %163 = arith.subf %161, %162 : vector<24x1xf32>
    %cst_58 = arith.constant 0.000000e+00 : f32
    %164 = vector.broadcast %cst_58 : f32 to vector<24x1xf32>
    %165 = arith.subf %164, %163 : vector<24x1xf32>
    %166 = math.exp %165 : vector<24x1xf32>
    %cst_59 = arith.constant 1.000000e+00 : f32
    %167 = vector.broadcast %cst_59 : f32 to vector<24x1xf32>
    %168 = arith.addf %167, %166 : vector<24x1xf32>
    %cst_60 = arith.constant 1.000000e+00 : f32
    %169 = vector.broadcast %cst_60 : f32 to vector<24x1xf32>
    %170 = arith.divf %169, %168 : vector<24x1xf32>
    %cst_61 = arith.constant 1.000000e+00 : f32
    %171 = vector.broadcast %cst_61 : f32 to vector<24x1xf32>
    %172 = arith.subf %171, %170 : vector<24x1xf32>
    %173 = vector.broadcast %170 : vector<24x1xf32> to vector<24x32xf32>
    %174 = arith.mulf %173, %132 : vector<24x32xf32>
    %175 = vector.broadcast %172 : vector<24x1xf32> to vector<24x32xf32>
    %176 = arith.mulf %175, %132 : vector<24x32xf32>
    %cst_62 = arith.constant dense<0.000000e+00> : vector<32xf32>
    %177 = vector.multi_reduction <add>, %174, %cst_62 [0] : vector<24x32xf32> to vector<32xf32>
    %178 = vector.shape_cast %177 : vector<32xf32> to vector<1x32xf32>
    %cst_63 = arith.constant 2.400000e+01 : f32
    %179 = vector.broadcast %cst_63 : f32 to vector<1x32xf32>
    %180 = arith.divf %178, %179 : vector<1x32xf32>
    %181 = arith.mulf %174, %174 : vector<24x32xf32>
    %cst_64 = arith.constant dense<0.000000e+00> : vector<32xf32>
    %182 = vector.multi_reduction <add>, %181, %cst_64 [0] : vector<24x32xf32> to vector<32xf32>
    %183 = vector.shape_cast %182 : vector<32xf32> to vector<1x32xf32>
    %cst_65 = arith.constant 2.400000e+01 : f32
    %184 = vector.broadcast %cst_65 : f32 to vector<1x32xf32>
    %185 = arith.divf %183, %184 : vector<1x32xf32>
    %186 = arith.mulf %180, %180 : vector<1x32xf32>
    %187 = arith.subf %185, %186 : vector<1x32xf32>
    %cst_66 = arith.constant 0.000000e+00 : f32
    %188 = vector.broadcast %cst_66 : f32 to vector<1x32xf32>
    %189 = arith.maximumf %187, %188 : vector<1x32xf32>
    %190 = vector.broadcast %180 : vector<1x32xf32> to vector<24x32xf32>
    %191 = arith.subf %174, %190 : vector<24x32xf32>
    %cst_67 = arith.constant 9.99999974E-6 : f32
    %192 = vector.broadcast %cst_67 : f32 to vector<1x32xf32>
    %193 = arith.addf %189, %192 : vector<1x32xf32>
    %194 = math.rsqrt %193 : vector<1x32xf32>
    %195 = vector.broadcast %194 : vector<1x32xf32> to vector<24x32xf32>
    %196 = arith.mulf %191, %195 : vector<24x32xf32>
    %cst_68 = arith.constant 9.99999974E-5 : f32
    %197 = vector.broadcast %cst_68 : f32 to vector<24x32xf32>
    %198 = arith.addf %196, %197 : vector<24x32xf32>
    %cst_69 = arith.constant dense<0.000000e+00> : vector<32xf32>
    %199 = vector.multi_reduction <add>, %176, %cst_69 [0] : vector<24x32xf32> to vector<32xf32>
    %200 = vector.shape_cast %199 : vector<32xf32> to vector<1x32xf32>
    %cst_70 = arith.constant 2.400000e+01 : f32
    %201 = vector.broadcast %cst_70 : f32 to vector<1x32xf32>
    %202 = arith.divf %200, %201 : vector<1x32xf32>
    %203 = arith.mulf %176, %176 : vector<24x32xf32>
    %cst_71 = arith.constant dense<0.000000e+00> : vector<32xf32>
    %204 = vector.multi_reduction <add>, %203, %cst_71 [0] : vector<24x32xf32> to vector<32xf32>
    %205 = vector.shape_cast %204 : vector<32xf32> to vector<1x32xf32>
    %cst_72 = arith.constant 2.400000e+01 : f32
    %206 = vector.broadcast %cst_72 : f32 to vector<1x32xf32>
    %207 = arith.divf %205, %206 : vector<1x32xf32>
    %208 = arith.mulf %202, %202 : vector<1x32xf32>
    %209 = arith.subf %207, %208 : vector<1x32xf32>
    %cst_73 = arith.constant 0.000000e+00 : f32
    %210 = vector.broadcast %cst_73 : f32 to vector<1x32xf32>
    %211 = arith.maximumf %209, %210 : vector<1x32xf32>
    %212 = vector.broadcast %202 : vector<1x32xf32> to vector<24x32xf32>
    %213 = arith.subf %176, %212 : vector<24x32xf32>
    %cst_74 = arith.constant 9.99999974E-6 : f32
    %214 = vector.broadcast %cst_74 : f32 to vector<1x32xf32>
    %215 = arith.addf %211, %214 : vector<1x32xf32>
    %216 = math.rsqrt %215 : vector<1x32xf32>
    %217 = vector.broadcast %216 : vector<1x32xf32> to vector<24x32xf32>
    %218 = arith.mulf %213, %217 : vector<24x32xf32>
    %cst_75 = arith.constant 9.99999974E-5 : f32
    %219 = vector.broadcast %cst_75 : f32 to vector<24x32xf32>
    %220 = arith.addf %218, %219 : vector<24x32xf32>
    %221 = tpu.concatenate %198, %220 in 1 : vector<24x32xf32>, vector<24x32xf32> -> vector<24x64xf32>
    %c232 = arith.constant 232 : index
    %c0_76 = arith.constant 0 : index
    %222 = vector.load %arg3[%c232, %c0_76] : memref<432x128xf32, #tpu.memory_space<vmem>>, vector<64x128xf32>
    %cst_77 = arith.constant dense<0.000000e+00> : vector<24x128xf32>
    %223 = tpu.matmul %221, %222, %cst_77 {dimension_numbers = #tpu.dot_dimension_numbers<[1], [0], [0], [1], [0, 0, 1, 1], [], []>} : vector<24x64xf32>, vector<64x128xf32>, vector<24x128xf32> -> vector<24x128xf32>
    %224 = vector.extract_strided_slice %223 {offsets = [0, 0], sizes = [24, 64], strides = [1, 1]} : vector<24x128xf32> to vector<24x64xf32>
    %225 = tpu.concatenate %152, %154 in 1 : vector<48x1xf32>, vector<48x1xf32> -> vector<48x2xf32>
    %cst_78 = arith.constant dense<0.000000e+00> : vector<24x2xf32>
    %226 = tpu.matmul %9, %225, %cst_78 {dimension_numbers = #tpu.dot_dimension_numbers<[1], [0], [0], [1], [0, 0, 1, 1], [], []>} : vector<24x48xf32>, vector<48x2xf32>, vector<24x2xf32> -> vector<24x2xf32>
    %cst_79 = arith.constant 1.000000e+00 : f32
    %227 = vector.broadcast %cst_79 : f32 to vector<24x2xf32>
    %228 = arith.addf %227, %226 : vector<24x2xf32>
    %229 = math.rsqrt %228 : vector<24x2xf32>
    %230 = vector.extract_strided_slice %229 {offsets = [0, 0], sizes = [24, 1], strides = [1, 1]} : vector<24x2xf32> to vector<24x1xf32>
    %231 = vector.shape_cast %230 : vector<24x1xf32> to vector<24x1xf32>
    %232 = vector.broadcast %231 : vector<24x1xf32> to vector<24x32xf32>
    %233 = vector.extract_strided_slice %229 {offsets = [0, 1], sizes = [24, 1], strides = [1, 1]} : vector<24x2xf32> to vector<24x1xf32>
    %234 = vector.shape_cast %233 : vector<24x1xf32> to vector<24x1xf32>
    %235 = vector.broadcast %234 : vector<24x1xf32> to vector<24x32xf32>
    %236 = tpu.concatenate %232, %235 in 1 : vector<24x32xf32>, vector<24x32xf32> -> vector<24x64xf32>
    %237 = vector.shape_cast %152 : vector<48x1xf32> to vector<48x1xf32>
    %238 = vector.broadcast %237 : vector<48x1xf32> to vector<48x32xf32>
    %239 = vector.shape_cast %154 : vector<48x1xf32> to vector<48x1xf32>
    %240 = vector.broadcast %239 : vector<48x1xf32> to vector<48x32xf32>
    %241 = tpu.concatenate %238, %240 in 1 : vector<48x32xf32>, vector<48x32xf32> -> vector<48x64xf32>
    %242 = arith.mulf %236, %224 : vector<24x64xf32>
    %cst_80 = arith.constant dense<0.000000e+00> : vector<48x64xf32>
    %243 = tpu.matmul %9, %242, %cst_80 {dimension_numbers = #tpu.dot_dimension_numbers<[0], [0], [1], [1], [0, 1, 1, 1], [], []>} : vector<24x48xf32>, vector<24x64xf32>, vector<48x64xf32> -> vector<48x64xf32>
    %244 = arith.mulf %241, %243 : vector<48x64xf32>
    %cst_81 = arith.constant dense<0.000000e+00> : vector<24x64xf32>
    %245 = tpu.matmul %10, %244, %cst_81 {dimension_numbers = #tpu.dot_dimension_numbers<[1], [0], [0], [1], [0, 0, 1, 1], [], []>} : vector<24x48xf32>, vector<48x64xf32>, vector<24x64xf32> -> vector<24x64xf32>
    %246 = arith.mulf %236, %245 : vector<24x64xf32>
    %247 = arith.mulf %236, %236 : vector<24x64xf32>
    %248 = arith.mulf %247, %224 : vector<24x64xf32>
    %249 = arith.addf %246, %248 : vector<24x64xf32>
    %c408 = arith.constant 408 : index
    %c0_82 = arith.constant 0 : index
    %250 = vector.load %arg3[%c408, %c0_82] : memref<432x128xf32, #tpu.memory_space<vmem>>, vector<1x128xf32>
    %251 = vector.extract_strided_slice %250 {offsets = [0, 0], sizes = [1, 64], strides = [1, 1]} : vector<1x128xf32> to vector<1x64xf32>
    %252 = vector.broadcast %251 : vector<1x64xf32> to vector<24x64xf32>
    %253 = arith.addf %249, %252 : vector<24x64xf32>
    %cst_83 = arith.constant 0.000000e+00 : f32
    %254 = vector.broadcast %cst_83 : f32 to vector<24x64xf32>
    %255 = arith.maximumf %253, %254 : vector<24x64xf32>
    %cst_84 = arith.constant dense<0.000000e+00> : vector<2x64xf32>
    %256 = tpu.matmul %16, %255, %cst_84 {dimension_numbers = #tpu.dot_dimension_numbers<[1], [0], [0], [1], [0, 0, 1, 1], [], []>} : vector<2x24xf32>, vector<24x64xf32>, vector<2x64xf32> -> vector<2x64xf32>
    %257 = vector.extract_strided_slice %256 {offsets = [0, 0], sizes = [2, 32], strides = [1, 1]} : vector<2x64xf32> to vector<2x32xf32>
    %258 = vector.extract_strided_slice %256 {offsets = [0, 32], sizes = [2, 32], strides = [1, 1]} : vector<2x64xf32> to vector<2x32xf32>
    %cst_85 = arith.constant dense<0.000000e+00> : vector<2x32xf32>
    %259 = tpu.matmul %22, %257, %cst_85 {dimension_numbers = #tpu.dot_dimension_numbers<[0], [0], [1], [1], [0, 1, 1, 1], [], []>} : vector<2x2xf32>, vector<2x32xf32>, vector<2x32xf32> -> vector<2x32xf32>
    %260 = arith.addf %259, %258 : vector<2x32xf32>
    %cst_86 = arith.constant dense<0.000000e+00> : vector<32xf32>
    %261 = vector.multi_reduction <add>, %257, %cst_86 [0] : vector<2x32xf32> to vector<32xf32>
    %262 = vector.shape_cast %261 : vector<32xf32> to vector<1x32xf32>
    %cst_87 = arith.constant 2.000000e+00 : f32
    %263 = vector.broadcast %cst_87 : f32 to vector<1x32xf32>
    %264 = arith.divf %262, %263 : vector<1x32xf32>
    %265 = arith.mulf %257, %257 : vector<2x32xf32>
    %cst_88 = arith.constant dense<0.000000e+00> : vector<32xf32>
    %266 = vector.multi_reduction <add>, %265, %cst_88 [0] : vector<2x32xf32> to vector<32xf32>
    %267 = vector.shape_cast %266 : vector<32xf32> to vector<1x32xf32>
    %cst_89 = arith.constant 2.000000e+00 : f32
    %268 = vector.broadcast %cst_89 : f32 to vector<1x32xf32>
    %269 = arith.divf %267, %268 : vector<1x32xf32>
    %270 = arith.mulf %264, %264 : vector<1x32xf32>
    %271 = arith.subf %269, %270 : vector<1x32xf32>
    %cst_90 = arith.constant 0.000000e+00 : f32
    %272 = vector.broadcast %cst_90 : f32 to vector<1x32xf32>
    %273 = arith.maximumf %271, %272 : vector<1x32xf32>
    %274 = vector.broadcast %264 : vector<1x32xf32> to vector<2x32xf32>
    %275 = arith.subf %257, %274 : vector<2x32xf32>
    %cst_91 = arith.constant 9.99999974E-6 : f32
    %276 = vector.broadcast %cst_91 : f32 to vector<1x32xf32>
    %277 = arith.addf %273, %276 : vector<1x32xf32>
    %278 = math.rsqrt %277 : vector<1x32xf32>
    %279 = vector.broadcast %278 : vector<1x32xf32> to vector<2x32xf32>
    %280 = arith.mulf %275, %279 : vector<2x32xf32>
    %cst_92 = arith.constant 9.99999974E-5 : f32
    %281 = vector.broadcast %cst_92 : f32 to vector<2x32xf32>
    %282 = arith.addf %280, %281 : vector<2x32xf32>
    %cst_93 = arith.constant dense<0.000000e+00> : vector<32xf32>
    %283 = vector.multi_reduction <add>, %258, %cst_93 [0] : vector<2x32xf32> to vector<32xf32>
    %284 = vector.shape_cast %283 : vector<32xf32> to vector<1x32xf32>
    %cst_94 = arith.constant 2.000000e+00 : f32
    %285 = vector.broadcast %cst_94 : f32 to vector<1x32xf32>
    %286 = arith.divf %284, %285 : vector<1x32xf32>
    %287 = arith.mulf %258, %258 : vector<2x32xf32>
    %cst_95 = arith.constant dense<0.000000e+00> : vector<32xf32>
    %288 = vector.multi_reduction <add>, %287, %cst_95 [0] : vector<2x32xf32> to vector<32xf32>
    %289 = vector.shape_cast %288 : vector<32xf32> to vector<1x32xf32>
    %cst_96 = arith.constant 2.000000e+00 : f32
    %290 = vector.broadcast %cst_96 : f32 to vector<1x32xf32>
    %291 = arith.divf %289, %290 : vector<1x32xf32>
    %292 = arith.mulf %286, %286 : vector<1x32xf32>
    %293 = arith.subf %291, %292 : vector<1x32xf32>
    %cst_97 = arith.constant 0.000000e+00 : f32
    %294 = vector.broadcast %cst_97 : f32 to vector<1x32xf32>
    %295 = arith.maximumf %293, %294 : vector<1x32xf32>
    %296 = vector.broadcast %286 : vector<1x32xf32> to vector<2x32xf32>
    %297 = arith.subf %258, %296 : vector<2x32xf32>
    %cst_98 = arith.constant 9.99999974E-6 : f32
    %298 = vector.broadcast %cst_98 : f32 to vector<1x32xf32>
    %299 = arith.addf %295, %298 : vector<1x32xf32>
    %300 = math.rsqrt %299 : vector<1x32xf32>
    %301 = vector.broadcast %300 : vector<1x32xf32> to vector<2x32xf32>
    %302 = arith.mulf %297, %301 : vector<2x32xf32>
    %cst_99 = arith.constant 9.99999974E-5 : f32
    %303 = vector.broadcast %cst_99 : f32 to vector<2x32xf32>
    %304 = arith.addf %302, %303 : vector<2x32xf32>
    %cst_100 = arith.constant dense<0.000000e+00> : vector<32xf32>
    %305 = vector.multi_reduction <add>, %260, %cst_100 [0] : vector<2x32xf32> to vector<32xf32>
    %306 = vector.shape_cast %305 : vector<32xf32> to vector<1x32xf32>
    %cst_101 = arith.constant 2.000000e+00 : f32
    %307 = vector.broadcast %cst_101 : f32 to vector<1x32xf32>
    %308 = arith.divf %306, %307 : vector<1x32xf32>
    %309 = arith.mulf %260, %260 : vector<2x32xf32>
    %cst_102 = arith.constant dense<0.000000e+00> : vector<32xf32>
    %310 = vector.multi_reduction <add>, %309, %cst_102 [0] : vector<2x32xf32> to vector<32xf32>
    %311 = vector.shape_cast %310 : vector<32xf32> to vector<1x32xf32>
    %cst_103 = arith.constant 2.000000e+00 : f32
    %312 = vector.broadcast %cst_103 : f32 to vector<1x32xf32>
    %313 = arith.divf %311, %312 : vector<1x32xf32>
    %314 = arith.mulf %308, %308 : vector<1x32xf32>
    %315 = arith.subf %313, %314 : vector<1x32xf32>
    %cst_104 = arith.constant 0.000000e+00 : f32
    %316 = vector.broadcast %cst_104 : f32 to vector<1x32xf32>
    %317 = arith.maximumf %315, %316 : vector<1x32xf32>
    %318 = vector.broadcast %308 : vector<1x32xf32> to vector<2x32xf32>
    %319 = arith.subf %260, %318 : vector<2x32xf32>
    %cst_105 = arith.constant 9.99999974E-6 : f32
    %320 = vector.broadcast %cst_105 : f32 to vector<1x32xf32>
    %321 = arith.addf %317, %320 : vector<1x32xf32>
    %322 = math.rsqrt %321 : vector<1x32xf32>
    %323 = vector.broadcast %322 : vector<1x32xf32> to vector<2x32xf32>
    %324 = arith.mulf %319, %323 : vector<2x32xf32>
    %cst_106 = arith.constant 9.99999974E-5 : f32
    %325 = vector.broadcast %cst_106 : f32 to vector<2x32xf32>
    %326 = arith.addf %324, %325 : vector<2x32xf32>
    %327 = tpu.concatenate %282, %304, %326 in 0 : vector<2x32xf32>, vector<2x32xf32>, vector<2x32xf32> -> vector<6x32xf32>
    %c296 = arith.constant 296 : index
    %c0_107 = arith.constant 0 : index
    %328 = vector.load %arg3[%c296, %c0_107] : memref<432x128xf32, #tpu.memory_space<vmem>>, vector<32x128xf32>
    %cst_108 = arith.constant dense<0.000000e+00> : vector<6x128xf32>
    %329 = tpu.matmul %327, %328, %cst_108 {dimension_numbers = #tpu.dot_dimension_numbers<[1], [0], [0], [1], [0, 0, 1, 1], [], []>} : vector<6x32xf32>, vector<32x128xf32>, vector<6x128xf32> -> vector<6x128xf32>
    %c416 = arith.constant 416 : index
    %c0_109 = arith.constant 0 : index
    %330 = vector.load %arg3[%c416, %c0_109] : memref<432x128xf32, #tpu.memory_space<vmem>>, vector<1x128xf32>
    %331 = vector.broadcast %330 : vector<1x128xf32> to vector<6x128xf32>
    %332 = arith.addf %329, %331 : vector<6x128xf32>
    %333 = vector.extract_strided_slice %332 {offsets = [0, 0], sizes = [6, 64], strides = [1, 1]} : vector<6x128xf32> to vector<6x64xf32>
    %334 = vector.extract_strided_slice %333 {offsets = [0, 0], sizes = [4, 32], strides = [1, 1]} : vector<6x64xf32> to vector<4x32xf32>
    %335 = vector.extract_strided_slice %333 {offsets = [4, 32], sizes = [2, 32], strides = [1, 1]} : vector<6x64xf32> to vector<2x32xf32>
    %336 = tpu.concatenate %334, %335 in 0 : vector<4x32xf32>, vector<2x32xf32> -> vector<6x32xf32>
    %cst_110 = arith.constant 0.000000e+00 : f32
    %337 = vector.broadcast %cst_110 : f32 to vector<6x32xf32>
    %338 = arith.maximumf %336, %337 : vector<6x32xf32>
    %339 = vector.extract_strided_slice %338 {offsets = [0, 0], sizes = [2, 32], strides = [1, 1]} : vector<6x32xf32> to vector<2x32xf32>
    %cst_111 = arith.constant dense<0.000000e+00> : vector<32xf32>
    %340 = vector.multi_reduction <add>, %339, %cst_111 [0] : vector<2x32xf32> to vector<32xf32>
    %341 = vector.shape_cast %340 : vector<32xf32> to vector<1x32xf32>
    %cst_112 = arith.constant 2.000000e+00 : f32
    %342 = vector.broadcast %cst_112 : f32 to vector<1x32xf32>
    %343 = arith.divf %341, %342 : vector<1x32xf32>
    %344 = arith.mulf %339, %339 : vector<2x32xf32>
    %cst_113 = arith.constant dense<0.000000e+00> : vector<32xf32>
    %345 = vector.multi_reduction <add>, %344, %cst_113 [0] : vector<2x32xf32> to vector<32xf32>
    %346 = vector.shape_cast %345 : vector<32xf32> to vector<1x32xf32>
    %cst_114 = arith.constant 2.000000e+00 : f32
    %347 = vector.broadcast %cst_114 : f32 to vector<1x32xf32>
    %348 = arith.divf %346, %347 : vector<1x32xf32>
    %349 = arith.mulf %343, %343 : vector<1x32xf32>
    %350 = arith.subf %348, %349 : vector<1x32xf32>
    %cst_115 = arith.constant 0.000000e+00 : f32
    %351 = vector.broadcast %cst_115 : f32 to vector<1x32xf32>
    %352 = arith.maximumf %350, %351 : vector<1x32xf32>
    %353 = vector.broadcast %343 : vector<1x32xf32> to vector<2x32xf32>
    %354 = arith.subf %339, %353 : vector<2x32xf32>
    %cst_116 = arith.constant 9.99999974E-6 : f32
    %355 = vector.broadcast %cst_116 : f32 to vector<1x32xf32>
    %356 = arith.addf %352, %355 : vector<1x32xf32>
    %357 = math.rsqrt %356 : vector<1x32xf32>
    %358 = vector.broadcast %357 : vector<1x32xf32> to vector<2x32xf32>
    %359 = arith.mulf %354, %358 : vector<2x32xf32>
    %cst_117 = arith.constant 9.99999974E-5 : f32
    %360 = vector.broadcast %cst_117 : f32 to vector<2x32xf32>
    %361 = arith.addf %359, %360 : vector<2x32xf32>
    %362 = vector.extract_strided_slice %338 {offsets = [2, 0], sizes = [2, 32], strides = [1, 1]} : vector<6x32xf32> to vector<2x32xf32>
    %cst_118 = arith.constant dense<0.000000e+00> : vector<32xf32>
    %363 = vector.multi_reduction <add>, %362, %cst_118 [0] : vector<2x32xf32> to vector<32xf32>
    %364 = vector.shape_cast %363 : vector<32xf32> to vector<1x32xf32>
    %cst_119 = arith.constant 2.000000e+00 : f32
    %365 = vector.broadcast %cst_119 : f32 to vector<1x32xf32>
    %366 = arith.divf %364, %365 : vector<1x32xf32>
    %367 = arith.mulf %362, %362 : vector<2x32xf32>
    %cst_120 = arith.constant dense<0.000000e+00> : vector<32xf32>
    %368 = vector.multi_reduction <add>, %367, %cst_120 [0] : vector<2x32xf32> to vector<32xf32>
    %369 = vector.shape_cast %368 : vector<32xf32> to vector<1x32xf32>
    %cst_121 = arith.constant 2.000000e+00 : f32
    %370 = vector.broadcast %cst_121 : f32 to vector<1x32xf32>
    %371 = arith.divf %369, %370 : vector<1x32xf32>
    %372 = arith.mulf %366, %366 : vector<1x32xf32>
    %373 = arith.subf %371, %372 : vector<1x32xf32>
    %cst_122 = arith.constant 0.000000e+00 : f32
    %374 = vector.broadcast %cst_122 : f32 to vector<1x32xf32>
    %375 = arith.maximumf %373, %374 : vector<1x32xf32>
    %376 = vector.broadcast %366 : vector<1x32xf32> to vector<2x32xf32>
    %377 = arith.subf %362, %376 : vector<2x32xf32>
    %cst_123 = arith.constant 9.99999974E-6 : f32
    %378 = vector.broadcast %cst_123 : f32 to vector<1x32xf32>
    %379 = arith.addf %375, %378 : vector<1x32xf32>
    %380 = math.rsqrt %379 : vector<1x32xf32>
    %381 = vector.broadcast %380 : vector<1x32xf32> to vector<2x32xf32>
    %382 = arith.mulf %377, %381 : vector<2x32xf32>
    %cst_124 = arith.constant 9.99999974E-5 : f32
    %383 = vector.broadcast %cst_124 : f32 to vector<2x32xf32>
    %384 = arith.addf %382, %383 : vector<2x32xf32>
    %385 = vector.extract_strided_slice %338 {offsets = [4, 0], sizes = [2, 32], strides = [1, 1]} : vector<6x32xf32> to vector<2x32xf32>
    %cst_125 = arith.constant dense<0.000000e+00> : vector<32xf32>
    %386 = vector.multi_reduction <add>, %385, %cst_125 [0] : vector<2x32xf32> to vector<32xf32>
    %387 = vector.shape_cast %386 : vector<32xf32> to vector<1x32xf32>
    %cst_126 = arith.constant 2.000000e+00 : f32
    %388 = vector.broadcast %cst_126 : f32 to vector<1x32xf32>
    %389 = arith.divf %387, %388 : vector<1x32xf32>
    %390 = arith.mulf %385, %385 : vector<2x32xf32>
    %cst_127 = arith.constant dense<0.000000e+00> : vector<32xf32>
    %391 = vector.multi_reduction <add>, %390, %cst_127 [0] : vector<2x32xf32> to vector<32xf32>
    %392 = vector.shape_cast %391 : vector<32xf32> to vector<1x32xf32>
    %cst_128 = arith.constant 2.000000e+00 : f32
    %393 = vector.broadcast %cst_128 : f32 to vector<1x32xf32>
    %394 = arith.divf %392, %393 : vector<1x32xf32>
    %395 = arith.mulf %389, %389 : vector<1x32xf32>
    %396 = arith.subf %394, %395 : vector<1x32xf32>
    %cst_129 = arith.constant 0.000000e+00 : f32
    %397 = vector.broadcast %cst_129 : f32 to vector<1x32xf32>
    %398 = arith.maximumf %396, %397 : vector<1x32xf32>
    %399 = vector.broadcast %389 : vector<1x32xf32> to vector<2x32xf32>
    %400 = arith.subf %385, %399 : vector<2x32xf32>
    %cst_130 = arith.constant 9.99999974E-6 : f32
    %401 = vector.broadcast %cst_130 : f32 to vector<1x32xf32>
    %402 = arith.addf %398, %401 : vector<1x32xf32>
    %403 = math.rsqrt %402 : vector<1x32xf32>
    %404 = vector.broadcast %403 : vector<1x32xf32> to vector<2x32xf32>
    %405 = arith.mulf %400, %404 : vector<2x32xf32>
    %cst_131 = arith.constant 9.99999974E-5 : f32
    %406 = vector.broadcast %cst_131 : f32 to vector<2x32xf32>
    %407 = arith.addf %405, %406 : vector<2x32xf32>
    %408 = tpu.concatenate %361, %384, %407 in 0 : vector<2x32xf32>, vector<2x32xf32>, vector<2x32xf32> -> vector<6x32xf32>
    %c328 = arith.constant 328 : index
    %c0_132 = arith.constant 0 : index
    %409 = vector.load %arg3[%c328, %c0_132] : memref<432x128xf32, #tpu.memory_space<vmem>>, vector<32x128xf32>
    %cst_133 = arith.constant dense<0.000000e+00> : vector<6x128xf32>
    %410 = tpu.matmul %408, %409, %cst_133 {dimension_numbers = #tpu.dot_dimension_numbers<[1], [0], [0], [1], [0, 0, 1, 1], [], []>} : vector<6x32xf32>, vector<32x128xf32>, vector<6x128xf32> -> vector<6x128xf32>
    %c424 = arith.constant 424 : index
    %c0_134 = arith.constant 0 : index
    %411 = vector.load %arg3[%c424, %c0_134] : memref<432x128xf32, #tpu.memory_space<vmem>>, vector<1x128xf32>
    %412 = vector.broadcast %411 : vector<1x128xf32> to vector<6x128xf32>
    %413 = arith.addf %410, %412 : vector<6x128xf32>
    %414 = vector.extract_strided_slice %413 {offsets = [0, 0], sizes = [6, 6], strides = [1, 1]} : vector<6x128xf32> to vector<6x6xf32>
    %415 = vector.extract_strided_slice %414 {offsets = [0, 0], sizes = [4, 3], strides = [1, 1]} : vector<6x6xf32> to vector<4x3xf32>
    %416 = vector.extract_strided_slice %414 {offsets = [4, 3], sizes = [2, 3], strides = [1, 1]} : vector<6x6xf32> to vector<2x3xf32>
    %417 = tpu.concatenate %415, %416 in 0 : vector<4x3xf32>, vector<2x3xf32> -> vector<6x3xf32>
    %cst_135 = arith.constant dense<0xFF800000> : vector<6xf32>
    %418 = vector.multi_reduction <maximumf>, %417, %cst_135 [1] : vector<6x3xf32> to vector<6xf32>
    %419 = vector.shape_cast %418 : vector<6xf32> to vector<6x1xf32>
    %420 = vector.broadcast %419 : vector<6x1xf32> to vector<6x3xf32>
    %421 = arith.subf %417, %420 : vector<6x3xf32>
    %422 = math.exp %421 : vector<6x3xf32>
    %cst_136 = arith.constant dense<0.000000e+00> : vector<6xf32>
    %423 = vector.multi_reduction <add>, %422, %cst_136 [1] : vector<6x3xf32> to vector<6xf32>
    %424 = vector.shape_cast %423 : vector<6xf32> to vector<6x1xf32>
    %425 = math.log %424 : vector<6x1xf32>
    %426 = vector.broadcast %425 : vector<6x1xf32> to vector<6x3xf32>
    %427 = arith.subf %421, %426 : vector<6x3xf32>
    %c0_137 = arith.constant 0 : index
    %c0_138 = arith.constant 0 : index
    %428 = vector.load %arg4[%c0_137, %c0_138] : memref<6x3xf32, #tpu.memory_space<vmem>>, vector<6x3xf32>
    tpu.vector_store %arg4[%c0_137, %c0_138], %427 {strides = array<i32>} : memref<6x3xf32, #tpu.memory_space<vmem>>, vector<6x3xf32>,
    return
  }
  func.func @transform_0(%arg0: i32) -> (i32, i32) {
    %c0_i32 = arith.constant 0 : i32
    %c0_i32_0 = arith.constant 0 : i32
    %c0_i32_1 = arith.constant 0 : i32
    return %c0_i32, %c0_i32_0 : i32, i32
  }
  func.func @transform_1(%arg0: i32) -> (i32, i32) {
    %c0_i32 = arith.constant 0 : i32
    %c0_i32_0 = arith.constant 0 : i32
    %c0_i32_1 = arith.constant 0 : i32
    return %c0_i32, %c0_i32_0 : i32, i32
  }
  func.func @transform_2(%arg0: i32) -> (i32, i32) {
    %c0_i32 = arith.constant 0 : i32
    %c0_i32_0 = arith.constant 0 : i32
    %c0_i32_1 = arith.constant 0 : i32
    return %c0_i32, %c0_i32_0 : i32, i32
  }
  func.func @transform_3(%arg0: i32) -> (i32, i32) {
    %c0_i32 = arith.constant 0 : i32
    %c0_i32_0 = arith.constant 0 : i32
    %c0_i32_1 = arith.constant 0 : i32
    return %c0_i32, %c0_i32_0 : i32, i32
  }
}

</mosaic_0001>

<bundles_post_ra>
// kernel: tpu_custom_call.1
= control target key start
LH: loop header
LB: loop body
LE: loop exit
PB: predicated region body
PF: predicated region fallthrough
CT: control target
= control target key end

     0   :  { %8 = vsyncpa [#allocation3], 0  ;;  %s3511_s12 = smov [#allocation2]   ;;  %s4098_s0 = inlined_call_operand.vmem [shape: s32[4,48], index: 0, kind: input, shape index: {}]   ;;  %s4099_s1 = inlined_call_operand.vmem [shape: f32[24,8], index: 1, kind: input, shape index: {}]   ;;  %s4100_s2 = inlined_call_operand.hbm [shape: f32[432,128], index: 2, kind: input, shape index: {}]   ;;  %s4101_s3 = inlined_call_operand.vmem [shape: f32[6,3], index: 3, kind: output, shape index: {}]  }
   0x1   :  { %s18_s13 = sshll.u32 %s3511_s12, 4  ;;  %s19_s13 = int_to_ptr.vmem [resolvable:$true] %s18_s13 }
   0x2   :  { %s3497_s14 = scalar_lea.vmem %s19_s13, 6912  ;;  %p3502_p1 = scmp.lt.s32.totalorder %s19_s13, %s19_s13 }
   0x3   :  { %p3498_p0 = scmp.ne.s32.totalorder %s19_s13, %s3497_s14  ;;  %p3503_p2 = scmp.lt.s32.totalorder %s3497_s14, %s3497_s14 }
   0x5   :  { %p3504_p3 = por %p3503_p2, %p3502_p1 }
   0x7   :  { %p3505_p4 = pnand %p3504_p3, %p3498_p0 }
   0x9   :  { %3508 = shalt.err (!%p3505_p4)
}
   0xa   :  { %s3512_s15 = smov 128   ;;  %s3513_s16 = smov 8  }
   0xb   :  { %24 = dma.hbm_to_vmem [thread:$0]  %s4100_s2, 6912, %s19_s13, [#allocation3], %s3512_s15, %s3512_s15, %s3513_s16  }
   0xc   :  { %3509 = dma.done.wait [#allocation3], 6912  }
   0xd   :  { %3510 = vsyncadd [#allocation3], 4294960384  ;;  %v3514_v0 = vmov 0.0   ;;  %vm3515_vm0 = vmmov 0   ;;  %vm68_vm1 = vcmask 64512   ;;  %v111_v2 = vld [vmem:[#allocation2] sm:$0xff]  ;;  %v34_v48 = vlaneseq }
   0xe   :  { %3065 = vmatprep.subr.mxu0 %v3514_v0  ;;  %3067 = vmatprep.mubr.msk.f32.mxu0 %vm3515_vm0, %v3514_v0  ;;  %v3554_v1 = vld [vmem:[%s4098_s0] sm:$0xf]  ;;  %v66_v5 = vld [vmem:[%s4099_s1 + $0x8] sm:$0xff]  ;;  %v67_v6 = vld [vmem:[%s4099_s1 + $0x10] sm:$0xff]  ;;  %s3516_s26 = smov 48   ;;  %vm32_vm2 = vcmask 392192  }
   0xf   :  { %v65_v3 = vld [vmem:[%s4099_s1] sm:$0xff]  ;;  %v29_v4 = vrot.slane %v3554_v1, 1  ;;  %3066 = vmatpush3.msra.mxu0 %v111_v2  ;;  %v70_v9 = vsel %vm68_vm1, %v66_v5, 0.0  ;;  %v72_v10 = vsel %vm68_vm1, %v67_v6, 0.0  ;;  %v83_v11 = vmul.f32 %v66_v5, %v66_v5  ;;  %s3517_s1 = smov 80   ;;  %s3518_s27 = smov 32  }
  0x10   :  { %v69_v7 = vsel %vm68_vm1, %v65_v3, 0.0  ;;  %v82_v8 = vmul.f32 %v65_v3, %v65_v3  ;;  %v84_v12 = vmul.f32 %v67_v6, %v67_v6  ;;  %3091 = vmatprep.subr.mxu0 %v3514_v0  ;;  %v3582_v49 = vshrl.u32 %v34_v48, 7  ;;  %s3519_s28 = smov 127   ;;  %s3521_s29 = smov 1  }
  0x11   :  { %30 = vrot.lane.b32.xlu0 %v29_v4, %s3516_s26  ;;  %v71_v13 = vadd.f32 %v70_v9, %v69_v7  ;;  %v86_v15 = vsel %vm68_vm1, %v83_v11, 0.0  ;;  %vm236_vm6 = vcmask 195584   ;;  %v451_v11 = vld [vmem:[#allocation2 + $0x20] sm:$0xff]  ;;  %vm457_vm7 = vcmask 261120   ;;  %s3524_s5 = smov 125  }
  0x12   :  { %v85_v14 = vsel %vm68_vm1, %v82_v8, 0.0  ;;  %v88_v16 = vsel %vm68_vm1, %v84_v12, 0.0  ;;  %v40_v50 = vsub.s32 0, %v3582_v49  ;;  %v36_v54 = vadd.s32 8, %v3582_v49  ;;  %v450_v12 = vld [vmem:[#allocation2 + $0x18] sm:$0xff] }
  0x13   :  { %v73_v17 = vadd.f32 %v72_v10, %v71_v13  ;;  %v87_v18 = vadd.f32 %v86_v15, %v85_v14  ;;  %v37_v56 = vadd.s32 16, %v3582_v49  ;;  %vm1299_vm8 = vcmask 523264  }
  0x14   :  { %vm1873_vm9 = vcmask 7168   ;;  %vm2452_vm12 = vcmask 254976   ;;  %vm2379_vm13 = vcmask 1041408   ;;  %vm2479_vm14 = vcmask 517376  }
  0x15   :  { %v74_v19 = vrot.slane %v73_v17, 4  ;;  %v89_v20 = vadd.f32 %v88_v16, %v87_v18  ;;  %vm2375_vm15 = vcmask 15360  }
  0x17   :  { %v75_v21 = vadd.f32 %v74_v19, %v73_v17  ;;  %v90_v22 = vrot.slane %v89_v20, 4 }
  0x19   :  { %v76_v23 = vrot.slane %v75_v21, 2  ;;  %v91_v24 = vadd.f32 %v90_v22, %v89_v20  ;;  %v449_v22 = vld [vmem:[#allocation2 + $0x10] sm:$0xff] }
  0x1b   :  { %v77_v25 = vadd.f32 %v76_v23, %v75_v21  ;;  %v92_v26 = vrot.slane %v91_v24, 2  ;;  %v448_v23 = vld [vmem:[#allocation2 + $0x8] sm:$0xff] }
  0x1d   :  { %v78_v27 = vrot.slane %v77_v25, 1  ;;  %v93_v28 = vadd.f32 %v92_v26, %v91_v24 }
  0x1f   :  { %v79_v29 = vadd.f32 %v78_v27, %v77_v25  ;;  %v94_v30 = vrot.slane %v93_v28, 1 }
  0x21   :  { %v81_v31 = vmul.f32 0.041666668, %v79_v29  ;;  %v95_v32 = vadd.f32 %v94_v30, %v93_v28 }
  0x23   :  { %v96_v33 = vmul.f32 0.041666668, %v95_v32  ;;  %v97_v34 = vmul.f32 %v81_v31, %v81_v31  ;;  %v100_v38 = vsub.f32 %v65_v3, %v81_v31  ;;  %v101_v39 = vsub.f32 %v66_v5, %v81_v31 }
  0x24   :  { %v102_v43 = vsub.f32 %v67_v6, %v81_v31 }
  0x25   :  { %v98_v35 = vsub.f32 %v96_v33, %v97_v34  ;;  %v594_v33 = vld [vmem:[#allocation2 + $0x40] sm:$0xff]  ;;  %v593_v34 = vld [vmem:[#allocation2 + $0x38] sm:$0xff] }
  0x27   :  { %v99_v36 = vmax.f32 %v98_v35, 0.0  ;;  %v592_v35 = vld [vmem:[#allocation2 + $0x30] sm:$0xff] }
  0x29   :  { %v103_v37 = vadd.f32 1e-05, %v99_v36  ;;  %v591_v36 = vld [vmem:[#allocation2 + $0x28] sm:$0xff] }
  0x2b   :  { %3420 = vrsqrt.f32 %v103_v37  ;;  %v2836_v37 = vld [vmem:[#allocation2 + $0x168] ss:$0 sm:$0xff] }
  0x38   :  { %v3421_v40 = vpop.eup %3420 }
  0x39   :  { %v105_v41 = vmul.f32 %v3421_v40, %v100_v38  ;;  %v106_v42 = vmul.f32 %v3421_v40, %v101_v39  ;;  %v107_v46 = vmul.f32 %v3421_v40, %v102_v43 }
  0x3b   :  { %v108_v44 = vadd.f32 0.0001, %v105_v41  ;;  %v109_v45 = vadd.f32 0.0001, %v106_v42  ;;  %v110_v47 = vadd.f32 0.0001, %v107_v46 }
  0x3d   :  { %3068 = vmatmul.mubr.msk.f32.vlgmr.msra.gmra.mxu0 %vm68_vm1, %v108_v44 }
  0x3e   :  { %3070 = vmatprep.mubr.msk.f32.mxu0 %vm3515_vm0, %v3514_v0 }
  0x41   :  { %3071 = vmatmul.mubr.msk.f32.gmra.mxu0 %vm68_vm1, %v109_v45 }
  0x42   :  { %3073 = vmatprep.mubr.msk.f32.mxu0 %vm3515_vm0, %v3514_v0 }
  0x45   :  { %3074 = vmatmul.mubr.msk.f32.gmra.mxu0 %vm68_vm1, %v110_v47  ;;  %vm2800_vm1 = vcmask 21504  }
  0x46   :  { %3103 = vmatprep.mubr.msk.f32.mxu0 %vm3515_vm0, %v3514_v0 }
  0x83   :  { %v31_v51 = vpop.permute.xlu0 %30 }
  0x84   :  { %v33_v52 = vsel %vm32_vm2, %v3554_v1, %v31_v51 }
  0x85   :  { %v41_v53 = vrot.slane %v33_v52, %v40_v50 }
  0x87   :  { %vm42_vm3 = vcmp.eq.s32.totalorder %v3582_v49, %v41_v53  ;;  %vm43_vm4 = vcmp.eq.s32.totalorder %v36_v54, %v41_v53  ;;  %vm44_vm5 = vcmp.eq.s32.totalorder %v37_v56, %v41_v53 }
  0x88   :  { %v3590_v55 = vsel %vm42_vm3, 1.0, %v3514_v0  ;;  %v3596_v57 = vsel %vm43_vm4, 1.0, %v3514_v0  ;;  %v3601_v58 = vsel %vm44_vm5, 1.0, %v3514_v0 }
  0x89   :  { %353 = vrot.lane.b32.xlu1 %v3590_v55, %s3517_s1  ;;  %204 = vxpose.xlu0.b32.start [1/3] (short) (narrow) %v3590_v55, 96 }
  0x8d   :  { %355 = vrot.lane.b32.xlu1 %v3596_v57, %s3517_s1  ;;  %205 = vxpose.xlu0.b32.cont [2/3] (short) (narrow) %v3596_v57, 96 }
  0x91   :  { %357 = vrot.lane.b32.xlu1 %v3601_v58, %s3517_s1  ;;  %206 = vxpose.xlu0.b32.end [3/3] (short) (narrow) %v3601_v58, 96 }
  0xfb   :  { %v3645_v19 = vpop.permute.xlu1 %353 }
  0xfd   :  { %v187_v59 = vpop.f32.mrf.mxu0 }
  0xfe   :  { %v201_v6 = vmax.f32 %v187_v59, 0.0 }
  0xff   :  { %v3069_v60 = vpop.f32.mrf.mxu0  ;;  %v3652_v20 = vpop.permute.xlu1 %355 }
 0x101   :  { %v192_v61 = vpop.f32.mrf.mxu0 }
 0x102   :  { %v3607_v2 = vmax.f32 %v192_v61, 0.0 }
 0x103   :  { %v3072_v62 = vpop.f32.mrf.mxu0  ;;  %v3660_v21 = vpop.permute.xlu1 %357 }
 0x105   :  { %v197_v63 = vpop.f32.mrf.mxu0  ;;  %v3605_v1 = vpop.trf.xlu0 }
 0x106   :  { %v3609_v3 = vmax.f32 %v197_v63, 0.0  ;;  %3082 = vmatprep.mubr.msk.f32.mxu1 %vm236_vm6, %v3605_v1 }
 0x107   :  { %v3075_v4 = vpop.f32.mrf.mxu0 }
 0x108   :  { %3076 = vmatprep.subr.mxu1 %v3609_v3 }
 0x109   :  { %3077 = vmatpush3.msra.mxu1 %v3609_v3  ;;  %v3615_v5 = vpop.trf.xlu0 }
 0x10a   :  { %3078 = vmatprep.subr.mxu1 %v3607_v2 }
 0x10b   :  { %3079 = vmatpush3.msra.mxu1 %v3607_v2 }
 0x10c   :  { %3080 = vmatprep.subr.mxu1 %v201_v6 }
 0x10d   :  { %3081 = vmatpush3.msra.mxu1 %v201_v6  ;;  %v3619_v7 = vpop.trf.xlu0 }
 0x10e   :  { %3083 = vmatmul.mubr.msk.f32.vlgmr.msra.gmra.mxu1 %vm236_vm6, %v3615_v5  ;;  %3112 = vmatprep.subr.mxu1 %v3514_v0 }
 0x10f   :  { %3085 = vmatprep.mubr.msk.f32.mxu1 %vm236_vm6, %v3619_v7  ;;  %3113 = vmatpush3.msra.mxu1 %v451_v11 }
 0x110   :  { %3114 = vmatprep.subr.mxu1 %v3514_v0 }
 0x111   :  { %v3626_v8 = vpop.trf.xlu0  ;;  %3115 = vmatpush3.msra.mxu1 %v450_v12 }
 0x112   :  { %3086 = vmatmul.mubr.msk.f32.gmra.mxu1 %vm236_vm6, %v3626_v8  ;;  %3116 = vmatprep.subr.mxu1 %v3514_v0 }
 0x113   :  { %3117 = vmatpush3.msra.mxu1 %v449_v22 }
 0x114   :  { %3118 = vmatprep.subr.mxu1 %v3514_v0 }
 0x115   :  { %v3630_v9 = vpop.trf.xlu0  ;;  %3119 = vmatpush3.msra.mxu1 %v448_v23 }
 0x116   :  { %3088 = vmatprep.mubr.msk.f32.mxu1 %vm236_vm6, %v3630_v9 }
 0x119   :  { %v3634_v10 = vpop.trf.xlu0 }
 0x11a   :  { %3089 = vmatmul.mubr.msk.f32.gmra.mxu1 %vm236_vm6, %v3634_v10 }
 0x11b   :  { %3120 = vmatprep.mubr.msk.f32.mxu1 %vm3515_vm0, %v3514_v0 }
 0x1ce   :  { %v3084_v13 = vpop.f32.mrf.mxu1 }
 0x1d0   :  { %v321_v14 = vpop.f32.mrf.mxu1 }
 0x1d2   :  { %v3087_v15 = vpop.f32.mrf.mxu1 }
 0x1d4   :  { %v331_v16 = vpop.f32.mrf.mxu1 }
 0x1da   :  { %v3090_v17 = vpop.f32.mrf.mxu1 }
 0x1db   :  { %3092 = vmatpush3.msra.mxu0 %v3090_v17 }
 0x1dc   :  { %v341_v18 = vpop.f32.mrf.mxu1  ;;  %3093 = vmatprep.subr.mxu0 %v3514_v0 }
 0x1dd   :  { %3094 = vmatpush3.msra.mxu0 %v341_v18 }
 0x1de   :  { %3095 = vmatprep.subr.mxu0 %v3514_v0 }
 0x1df   :  { %3096 = vmatpush3.msra.mxu0 %v3087_v15 }
 0x1e0   :  { %3097 = vmatprep.subr.mxu0 %v3514_v0 }
 0x1e1   :  { %3098 = vmatpush3.msra.mxu0 %v331_v16 }
 0x1e2   :  { %3099 = vmatprep.subr.mxu0 %v3514_v0 }
 0x1e3   :  { %3100 = vmatpush3.msra.mxu0 %v3084_v13 }
 0x1e4   :  { %3101 = vmatprep.subr.mxu0 %v3514_v0 }
 0x1e5   :  { %3102 = vmatpush3.msra.mxu0 %v321_v14 }
 0x1e6   :  { %3104 = vmatmul.mubr.msk.f32.vlgmr.msra.gmra.mxu0 %vm32_vm2, %v3645_v19  ;;  %3129 = vmatprep.subr.mxu0 %v3514_v0 }
 0x1e7   :  { %3106 = vmatprep.mubr.msk.f32.mxu0 %vm3515_vm0, %v3514_v0  ;;  %3130 = vmatpush3.msra.mxu0 %v594_v33 }
 0x1e8   :  { %3131 = vmatprep.subr.mxu0 %v3514_v0 }
 0x1e9   :  { %3132 = vmatpush3.msra.mxu0 %v593_v34 }
 0x1ea   :  { %3107 = vmatmul.mubr.msk.f32.gmra.mxu0 %vm32_vm2, %v3652_v20  ;;  %3133 = vmatprep.subr.mxu0 %v3514_v0 }
 0x1eb   :  { %3109 = vmatprep.mubr.msk.f32.mxu0 %vm3515_vm0, %v3514_v0  ;;  %3134 = vmatpush3.msra.mxu0 %v592_v35 }
 0x1ec   :  { %3135 = vmatprep.subr.mxu0 %v3514_v0 }
 0x1ed   :  { %3136 = vmatpush3.msra.mxu0 %v591_v36 }
 0x1ee   :  { %3110 = vmatmul.mubr.msk.f32.gmra.mxu0 %vm32_vm2, %v3660_v21  ;;  %3161 = vmatprep.subr.mxu0 %v3514_v0 }
 0x1ef   :  { %3137 = vmatprep.mubr.msk.f32.mxu0 %vm3515_vm0, %v3514_v0 }
 0x2a6   :  { %v431_v24 = vpop.f32.mrf.mxu0 }
 0x2a7   :  { %v445_v25 = vadd.f32 %v431_v24, %v201_v6 }
 0x2a8   :  { %v3105_v26 = vpop.f32.mrf.mxu0 }
 0x2a9   :  { %3121 = vmatmul.mubr.msk.f32.vlgmr.msra.gmra.mxu1 %vm457_vm7, %v445_v25 }
 0x2aa   :  { %v436_v27 = vpop.f32.mrf.mxu0  ;;  %3123 = vmatprep.mubr.msk.f32.mxu1 %vm3515_vm0, %v3514_v0 }
 0x2ab   :  { %v446_v28 = vadd.f32 %v436_v27, %v3607_v2 }
 0x2ac   :  { %v3108_v29 = vpop.f32.mrf.mxu0 }
 0x2ad   :  { %3124 = vmatmul.mubr.msk.f32.gmra.mxu1 %vm457_vm7, %v446_v28 }
 0x2ae   :  { %v441_v30 = vpop.f32.mrf.mxu0  ;;  %3126 = vmatprep.mubr.msk.f32.mxu1 %vm3515_vm0, %v3514_v0 }
 0x2af   :  { %v447_v31 = vadd.f32 %v441_v30, %v3609_v3 }
 0x2b0   :  { %v3111_v32 = vpop.f32.mrf.mxu0 }
 0x2b1   :  { %3127 = vmatmul.mubr.msk.f32.gmra.mxu1 %vm457_vm7, %v447_v31 }
 0x2b2   :  { %3152 = vmatprep.mubr.msk.f32.mxu1 %vm236_vm6, %v3605_v1 }
 0x369   :  { %v533_v38 = vpop.f32.mrf.mxu1 }
 0x36a   :  { %v534_v40 = vadd.f32 %v2836_v37, %v533_v38 }
 0x36b   :  { %v3122_v39 = vpop.f32.mrf.mxu1 }
 0x36c   :  { %v559_v44 = vmul.f32 %v534_v40, %v534_v40  ;;  %v547_v48 = vsel %vm457_vm7, %v534_v40, 0.0 }
 0x36d   :  { %v538_v41 = vpop.f32.mrf.mxu1 }
 0x36e   :  { %v539_v42 = vadd.f32 %v2836_v37, %v538_v41  ;;  %v562_v54 = vsel %vm457_vm7, %v559_v44, 0.0 }
 0x36f   :  { %v3125_v43 = vpop.f32.mrf.mxu1 }
 0x370   :  { %v548_v45 = vsel %vm457_vm7, %v539_v42, 0.0  ;;  %v560_v46 = vmul.f32 %v539_v42, %v539_v42 }
 0x371   :  { %v543_v47 = vpop.f32.mrf.mxu1  ;;  %v549_v52 = vadd.f32 %v548_v45, %v547_v48  ;;  %v2840_v45 = vld [vmem:[#allocation2 + $0x170] ss:$0 sm:$0xff] }
 0x372   :  { %v563_v50 = vsel %vm457_vm7, %v560_v46, 0.0  ;;  %v544_v51 = vadd.f32 %v2836_v37, %v543_v47 }
 0x373   :  { %v3128_v53 = vpop.f32.mrf.mxu1  ;;  %v564_v60 = vadd.f32 %v563_v50, %v562_v54 }
 0x374   :  { %v550_v56 = vsel %vm457_vm7, %v544_v51, 0.0  ;;  %v561_v59 = vmul.f32 %v544_v51, %v544_v51 }
 0x375   :  { %v551_v61 = vadd.f32 %v550_v56, %v549_v52  ;;  %v873_v56 = vld [vmem:[#allocation2 + $0x60] sm:$0xff] }
 0x376   :  { %v565_v62 = vsel %vm457_vm7, %v561_v59, 0.0  ;;  %v872_v59 = vld [vmem:[#allocation2 + $0x58] sm:$0xff] }
 0x377   :  { %v552_v63 = vrot.slane %v551_v61, 4  ;;  %v566_v2 = vadd.f32 %v565_v62, %v564_v60 }
 0x379   :  { %v553_v3 = vadd.f32 %v552_v63, %v551_v61  ;;  %v567_v4 = vrot.slane %v566_v2, 4 }
 0x37b   :  { %v554_v6 = vrot.slane %v553_v3, 2  ;;  %v568_v11 = vadd.f32 %v567_v4, %v566_v2  ;;  %v871_v4 = vld [vmem:[#allocation2 + $0x50] sm:$0xff] }
 0x37d   :  { %v555_v12 = vadd.f32 %v554_v6, %v553_v3  ;;  %v569_v13 = vrot.slane %v568_v11, 2  ;;  %v870_v6 = vld [vmem:[#allocation2 + $0x48] sm:$0xff] }
 0x37f   :  { %v556_v14 = vrot.slane %v555_v12, 1  ;;  %v570_v15 = vadd.f32 %v569_v13, %v568_v11 }
 0x381   :  { %v557_v16 = vadd.f32 %v556_v14, %v555_v12  ;;  %v571_v17 = vrot.slane %v570_v15, 1 }
 0x383   :  { %v558_v18 = vmul.f32 0.041666668, %v557_v16  ;;  %v572_v22 = vadd.f32 %v571_v17, %v570_v15 }
 0x385   :  { %v573_v23 = vmul.f32 0.041666668, %v572_v22  ;;  %v574_v24 = vmul.f32 %v558_v18, %v558_v18  ;;  %v577_v28 = vsub.f32 %v534_v40, %v558_v18  ;;  %v578_v29 = vsub.f32 %v539_v42, %v558_v18 }
 0x386   :  { %v579_v33 = vsub.f32 %v544_v51, %v558_v18 }
 0x387   :  { %v575_v25 = vsub.f32 %v573_v23, %v574_v24  ;;  %v1015_v23 = vld [vmem:[#allocation2 + $0x80] sm:$0xff]  ;;  %v1014_v24 = vld [vmem:[#allocation2 + $0x78] sm:$0xff] }
 0x389   :  { %v576_v26 = vmax.f32 %v575_v25, 0.0  ;;  %v1013_v25 = vld [vmem:[#allocation2 + $0x70] sm:$0xff] }
 0x38b   :  { %v580_v27 = vadd.f32 1e-05, %v576_v26  ;;  %v1012_v26 = vld [vmem:[#allocation2 + $0x68] sm:$0xff] }
 0x38d   :  { %3422 = vrsqrt.f32 %v580_v27  ;;  %v2853_v27 = vld [vmem:[#allocation2 + $0x178] ss:$0 sm:$0xff] }
 0x39a   :  { %v3423_v30 = vpop.eup %3422 }
 0x39b   :  { %v582_v31 = vmul.f32 %v3423_v30, %v577_v28  ;;  %v583_v32 = vmul.f32 %v3423_v30, %v578_v29  ;;  %v584_v35 = vmul.f32 %v3423_v30, %v579_v33 }
 0x39d   :  { %v585_v34 = vadd.f32 0.0001, %v582_v31  ;;  %v586_v37 = vadd.f32 0.0001, %v583_v32  ;;  %v587_v38 = vadd.f32 0.0001, %v584_v35 }
 0x39f   :  { %v588_v36 = vmax.f32 %v585_v34, 0.0  ;;  %v589_v39 = vmax.f32 %v586_v37, 0.0  ;;  %v590_v40 = vmax.f32 %v587_v38, 0.0 }
 0x3a1   :  { %3138 = vmatmul.mubr.msk.f32.vlgmr.msra.gmra.mxu0 %vm457_vm7, %v588_v36 }
 0x3a2   :  { %3140 = vmatprep.mubr.msk.f32.mxu0 %vm3515_vm0, %v3514_v0 }
 0x3a5   :  { %3141 = vmatmul.mubr.msk.f32.gmra.mxu0 %vm457_vm7, %v589_v39 }
 0x3a6   :  { %3143 = vmatprep.mubr.msk.f32.mxu0 %vm3515_vm0, %v3514_v0 }
 0x3a9   :  { %3144 = vmatmul.mubr.msk.f32.gmra.mxu0 %vm457_vm7, %v590_v40 }
 0x3aa   :  { %3173 = vmatprep.mubr.msk.f32.mxu0 %vm3515_vm0, %v3514_v0 }
 0x461   :  { %v675_v41 = vpop.f32.mrf.mxu0 }
 0x462   :  { %v676_v51 = vadd.f32 %v2840_v45, %v675_v41 }
 0x463   :  { %v3139_v42 = vpop.f32.mrf.mxu0 }
 0x464   :  { %v689_v54 = vmax.f32 %v676_v51, 0.0 }
 0x465   :  { %v680_v43 = vpop.f32.mrf.mxu0 }
 0x466   :  { %v681_v47 = vadd.f32 %v2840_v45, %v680_v43 }
 0x467   :  { %v3142_v44 = vpop.f32.mrf.mxu0 }
 0x468   :  { %v690_v53 = vmax.f32 %v681_v47, 0.0 }
 0x469   :  { %v685_v46 = vpop.f32.mrf.mxu0 }
 0x46a   :  { %v686_v48 = vadd.f32 %v2840_v45, %v685_v46 }
 0x46b   :  { %v3145_v50 = vpop.f32.mrf.mxu0 }
 0x46c   :  { %v691_v52 = vmax.f32 %v686_v48, 0.0 }
 0x46e   :  { %3146 = vmatprep.subr.mxu1 %v691_v52 }
 0x46f   :  { %3147 = vmatpush3.msra.mxu1 %v691_v52 }
 0x470   :  { %3148 = vmatprep.subr.mxu1 %v690_v53 }
 0x471   :  { %3149 = vmatpush3.msra.mxu1 %v690_v53 }
 0x472   :  { %3150 = vmatprep.subr.mxu1 %v689_v54 }
 0x473   :  { %3151 = vmatpush3.msra.mxu1 %v689_v54 }
 0x474   :  { %3153 = vmatmul.mubr.msk.f32.vlgmr.msra.gmra.mxu1 %vm236_vm6, %v3615_v5  ;;  %3182 = vmatprep.subr.mxu1 %v3514_v0 }
 0x475   :  { %3155 = vmatprep.mubr.msk.f32.mxu1 %vm236_vm6, %v3619_v7  ;;  %3183 = vmatpush3.msra.mxu1 %v873_v56 }
 0x476   :  { %3184 = vmatprep.subr.mxu1 %v3514_v0 }
 0x477   :  { %3185 = vmatpush3.msra.mxu1 %v872_v59 }
 0x478   :  { %3156 = vmatmul.mubr.msk.f32.gmra.mxu1 %vm236_vm6, %v3626_v8  ;;  %3186 = vmatprep.subr.mxu1 %v3514_v0 }
 0x479   :  { %3158 = vmatprep.mubr.msk.f32.mxu1 %vm236_vm6, %v3630_v9  ;;  %3187 = vmatpush3.msra.mxu1 %v871_v4 }
 0x47a   :  { %3188 = vmatprep.subr.mxu1 %v3514_v0 }
 0x47b   :  { %3189 = vmatpush3.msra.mxu1 %v870_v6 }
 0x47c   :  { %3159 = vmatmul.mubr.msk.f32.gmra.mxu1 %vm236_vm6, %v3634_v10 }
 0x47d   :  { %3190 = vmatprep.mubr.msk.f32.mxu1 %vm3515_vm0, %v3514_v0 }
 0x534   :  { %v3154_v60 = vpop.f32.mrf.mxu1 }
 0x536   :  { %v758_v61 = vpop.f32.mrf.mxu1 }
 0x538   :  { %v3157_v62 = vpop.f32.mrf.mxu1 }
 0x53a   :  { %v768_v63 = vpop.f32.mrf.mxu1 }
 0x53c   :  { %v3160_v2 = vpop.f32.mrf.mxu1 }
 0x53d   :  { %3162 = vmatpush3.msra.mxu0 %v3160_v2 }
 0x53e   :  { %v778_v3 = vpop.f32.mrf.mxu1  ;;  %3163 = vmatprep.subr.mxu0 %v3514_v0 }
 0x53f   :  { %3164 = vmatpush3.msra.mxu0 %v778_v3 }
 0x540   :  { %3165 = vmatprep.subr.mxu0 %v3514_v0 }
 0x541   :  { %3166 = vmatpush3.msra.mxu0 %v3157_v62 }
 0x542   :  { %3167 = vmatprep.subr.mxu0 %v3514_v0 }
 0x543   :  { %3168 = vmatpush3.msra.mxu0 %v768_v63 }
 0x544   :  { %3169 = vmatprep.subr.mxu0 %v3514_v0 }
 0x545   :  { %3170 = vmatpush3.msra.mxu0 %v3154_v60 }
 0x546   :  { %3171 = vmatprep.subr.mxu0 %v3514_v0 }
 0x547   :  { %3172 = vmatpush3.msra.mxu0 %v758_v61 }
 0x548   :  { %3174 = vmatmul.mubr.msk.f32.vlgmr.msra.gmra.mxu0 %vm32_vm2, %v3645_v19  ;;  %3199 = vmatprep.subr.mxu0 %v3514_v0 }
 0x549   :  { %3176 = vmatprep.mubr.msk.f32.mxu0 %vm3515_vm0, %v3514_v0  ;;  %3200 = vmatpush3.msra.mxu0 %v1015_v23 }
 0x54a   :  { %3201 = vmatprep.subr.mxu0 %v3514_v0 }
 0x54b   :  { %3202 = vmatpush3.msra.mxu0 %v1014_v24 }
 0x54c   :  { %3177 = vmatmul.mubr.msk.f32.gmra.mxu0 %vm32_vm2, %v3652_v20  ;;  %3203 = vmatprep.subr.mxu0 %v3514_v0 }
 0x54d   :  { %3179 = vmatprep.mubr.msk.f32.mxu0 %vm3515_vm0, %v3514_v0  ;;  %3204 = vmatpush3.msra.mxu0 %v1013_v25 }
 0x54e   :  { %3205 = vmatprep.subr.mxu0 %v3514_v0 }
 0x54f   :  { %3206 = vmatpush3.msra.mxu0 %v1012_v26 }
 0x550   :  { %3180 = vmatmul.mubr.msk.f32.gmra.mxu0 %vm32_vm2, %v3660_v21 }
 0x551   :  { %3207 = vmatprep.mubr.msk.f32.mxu0 %vm3515_vm0, %v3514_v0 }
 0x608   :  { %v853_v11 = vpop.f32.mrf.mxu0 }
 0x609   :  { %v867_v12 = vadd.f32 %v853_v11, %v689_v54 }
 0x60a   :  { %v3175_v13 = vpop.f32.mrf.mxu0 }
 0x60b   :  { %3191 = vmatmul.mubr.msk.f32.vlgmr.msra.gmra.mxu1 %vm457_vm7, %v867_v12 }
 0x60c   :  { %v858_v14 = vpop.f32.mrf.mxu0  ;;  %3193 = vmatprep.mubr.msk.f32.mxu1 %vm3515_vm0, %v3514_v0 }
 0x60d   :  { %v868_v15 = vadd.f32 %v858_v14, %v690_v53 }
 0x60e   :  { %v3178_v16 = vpop.f32.mrf.mxu0 }
 0x60f   :  { %3194 = vmatmul.mubr.msk.f32.gmra.mxu1 %vm457_vm7, %v868_v15 }
 0x610   :  { %v863_v17 = vpop.f32.mrf.mxu0  ;;  %3196 = vmatprep.mubr.msk.f32.mxu1 %vm3515_vm0, %v3514_v0 }
 0x611   :  { %v869_v18 = vadd.f32 %v863_v17, %v691_v52 }
 0x612   :  { %v3181_v22 = vpop.f32.mrf.mxu0 }
 0x613   :  { %3197 = vmatmul.mubr.msk.f32.gmra.mxu1 %vm457_vm7, %v869_v18 }
 0x614   :  { %3222 = vmatprep.mubr.msk.f32.mxu1 %vm236_vm6, %v3605_v1 }
 0x6cb   :  { %v954_v28 = vpop.f32.mrf.mxu1 }
 0x6cc   :  { %v955_v30 = vadd.f32 %v2853_v27, %v954_v28 }
 0x6cd   :  { %v3192_v29 = vpop.f32.mrf.mxu1 }
 0x6ce   :  { %v980_v34 = vmul.f32 %v955_v30, %v955_v30  ;;  %v968_v38 = vsel %vm457_vm7, %v955_v30, 0.0 }
 0x6cf   :  { %v959_v31 = vpop.f32.mrf.mxu1 }
 0x6d0   :  { %v960_v32 = vadd.f32 %v2853_v27, %v959_v31  ;;  %v983_v43 = vsel %vm457_vm7, %v980_v34, 0.0 }
 0x6d1   :  { %v3195_v33 = vpop.f32.mrf.mxu1 }
 0x6d2   :  { %v969_v35 = vsel %vm457_vm7, %v960_v32, 0.0  ;;  %v981_v36 = vmul.f32 %v960_v32, %v960_v32 }
 0x6d3   :  { %v964_v37 = vpop.f32.mrf.mxu1  ;;  %v970_v41 = vadd.f32 %v969_v35, %v968_v38  ;;  %v226_v35 = vpop.trf.xlu0 }
 0x6d4   :  { %v984_v39 = vsel %vm457_vm7, %v981_v36, 0.0  ;;  %v965_v40 = vadd.f32 %v2853_v27, %v964_v37  ;;  %v2857_v36 = vld [vmem:[#allocation2 + $0x180] ss:$0 sm:$0xff] }
 0x6d5   :  { %v3198_v42 = vpop.f32.mrf.mxu1  ;;  %v985_v46 = vadd.f32 %v984_v39, %v983_v43 }
 0x6d6   :  { %v971_v44 = vsel %vm457_vm7, %v965_v40, 0.0  ;;  %v982_v45 = vmul.f32 %v965_v40, %v965_v40 }
 0x6d7   :  { %v972_v47 = vadd.f32 %v971_v44, %v970_v41  ;;  %v227_v43 = vpop.trf.xlu0 }
 0x6d8   :  { %v986_v48 = vsel %vm457_vm7, %v982_v45, 0.0 }
 0x6d9   :  { %v973_v50 = vrot.slane %v972_v47, 4  ;;  %v987_v51 = vadd.f32 %v986_v48, %v985_v46 }
 0x6db   :  { %v974_v52 = vadd.f32 %v973_v50, %v972_v47  ;;  %v988_v53 = vrot.slane %v987_v51, 4  ;;  %v228_v46 = vpop.trf.xlu0 }
 0x6dd   :  { %v975_v54 = vrot.slane %v974_v52, 2  ;;  %v989_v56 = vadd.f32 %v988_v53, %v987_v51  ;;  %v1293_v51 = vld [vmem:[#allocation2 + $0xc0] sm:$0xff]  ;;  %v1291_v53 = vld [vmem:[#allocation2 + $0xb0] sm:$0xff] }
 0x6de   :  { %3240 = vmatprep.subr.mxu0 %v1293_v51 }
 0x6df   :  { %v976_v59 = vadd.f32 %v975_v54, %v974_v52  ;;  %v990_v60 = vrot.slane %v989_v56, 2  ;;  %v229_v47 = vpop.trf.xlu0  ;;  %v1292_v52 = vld [vmem:[#allocation2 + $0xb8] sm:$0xff]  ;;  %v1290_v54 = vld [vmem:[#allocation2 + $0xa8] sm:$0xff] }
 0x6e1   :  { %v977_v61 = vrot.slane %v976_v59, 1  ;;  %v991_v62 = vadd.f32 %v990_v60, %v989_v56  ;;  %v1289_v56 = vld [vmem:[#allocation2 + $0xa0] sm:$0xff]  ;;  %v1288_v60 = vld [vmem:[#allocation2 + $0x98] sm:$0xff] }
 0x6e3   :  { %v978_v63 = vadd.f32 %v977_v61, %v976_v59  ;;  %v992_v2 = vrot.slane %v991_v62, 1  ;;  %v230_v48 = vpop.trf.xlu0  ;;  %v1287_v61 = vld [vmem:[#allocation2 + $0x90] sm:$0xff] }
 0x6e5   :  { %v979_v3 = vmul.f32 0.041666668, %v978_v63  ;;  %v993_v4 = vadd.f32 %v992_v2, %v991_v62  ;;  %v1286_v2 = vld [vmem:[#allocation2 + $0x88] sm:$0xff] }
 0x6e7   :  { %v994_v6 = vmul.f32 0.041666668, %v993_v4  ;;  %v995_v11 = vmul.f32 %v979_v3, %v979_v3  ;;  %v998_v15 = vsub.f32 %v955_v30, %v979_v3  ;;  %v999_v16 = vsub.f32 %v960_v32, %v979_v3  ;;  %v231_v50 = vpop.trf.xlu0 }
 0x6e8   :  { %v1000_v23 = vsub.f32 %v965_v40, %v979_v3 }
 0x6e9   :  { %v996_v12 = vsub.f32 %v994_v6, %v995_v11 }
 0x6eb   :  { %v997_v13 = vmax.f32 %v996_v12, 0.0 }
 0x6ed   :  { %v1001_v14 = vadd.f32 1e-05, %v997_v13 }
 0x6ef   :  { %3424 = vrsqrt.f32 %v1001_v14 }
 0x6fc   :  { %v3425_v17 = vpop.eup %3424 }
 0x6fd   :  { %v1003_v18 = vmul.f32 %v3425_v17, %v998_v15  ;;  %v1004_v22 = vmul.f32 %v3425_v17, %v999_v16  ;;  %v1005_v25 = vmul.f32 %v3425_v17, %v1000_v23  ;;  %v1488_v23 = vld [vmem:[#allocation2 + $0xe0] sm:$0xff] }
 0x6ff   :  { %v1006_v24 = vadd.f32 0.0001, %v1003_v18  ;;  %v1007_v27 = vadd.f32 0.0001, %v1004_v22  ;;  %v1008_v28 = vadd.f32 0.0001, %v1005_v25 }
 0x700   :  { %v1487_v25 = vld [vmem:[#allocation2 + $0xd8] sm:$0xff] }
 0x701   :  { %v1009_v26 = vmax.f32 %v1006_v24, 0.0  ;;  %v1010_v29 = vmax.f32 %v1007_v27, 0.0  ;;  %v1011_v30 = vmax.f32 %v1008_v28, 0.0  ;;  %v1486_v27 = vld [vmem:[#allocation2 + $0xd0] sm:$0xff]  ;;  %v1485_v28 = vld [vmem:[#allocation2 + $0xc8] sm:$0xff] }
 0x703   :  { %3208 = vmatmul.mubr.msk.f32.vlgmr.msra.gmra.mxu0 %vm457_vm7, %v1009_v26 }
 0x704   :  { %3210 = vmatprep.mubr.msk.f32.mxu0 %vm3515_vm0, %v3514_v0  ;;  %3241 = vmatpush3.msra.mxu0 %v1293_v51 }
 0x705   :  { %3242 = vmatprep.subr.mxu0 %v1292_v52 }
 0x706   :  { %3243 = vmatpush3.msra.mxu0 %v1292_v52 }
 0x707   :  { %3211 = vmatmul.mubr.msk.f32.gmra.mxu0 %vm457_vm7, %v1010_v29  ;;  %3244 = vmatprep.subr.mxu0 %v1291_v53 }
 0x708   :  { %3213 = vmatprep.mubr.msk.f32.mxu0 %vm3515_vm0, %v3514_v0  ;;  %3245 = vmatpush3.msra.mxu0 %v1291_v53  ;;  %v2873_v53 = vld [vmem:[#allocation2 + $0x188] ss:$0 sm:$0xff] }
 0x709   :  { %3246 = vmatprep.subr.mxu0 %v1290_v54 }
 0x70a   :  { %3247 = vmatpush3.msra.mxu0 %v1290_v54 }
 0x70b   :  { %3214 = vmatmul.mubr.msk.f32.gmra.mxu0 %vm457_vm7, %v1011_v30  ;;  %3248 = vmatprep.subr.mxu0 %v1289_v56 }
 0x70c   :  { %3249 = vmatpush3.msra.mxu0 %v1289_v56 }
 0x70d   :  { %3250 = vmatprep.subr.mxu0 %v1288_v60 }
 0x70e   :  { %3251 = vmatpush3.msra.mxu0 %v1288_v60 }
 0x70f   :  { %3252 = vmatprep.subr.mxu0 %v1287_v61 }
 0x710   :  { %3253 = vmatpush3.msra.mxu0 %v1287_v61 }
 0x711   :  { %3254 = vmatprep.subr.mxu0 %v1286_v2 }
 0x712   :  { %3255 = vmatpush3.msra.mxu0 %v1286_v2 }
 0x713   :  { %3265 = vmatprep.subr.mxu0 %v3514_v0 }
 0x7c3   :  { %v1096_v31 = vpop.f32.mrf.mxu0 }
 0x7c4   :  { %v1097_v41 = vadd.f32 %v2857_v36, %v1096_v31 }
 0x7c5   :  { %v3209_v32 = vpop.f32.mrf.mxu0 }
 0x7c6   :  { %v3762_v45 = vmax.f32 %v1097_v41, 0.0 }
 0x7c7   :  { %v1101_v33 = vpop.f32.mrf.mxu0 }
 0x7c8   :  { %v1102_v38 = vadd.f32 %v2857_v36, %v1101_v33 }
 0x7c9   :  { %v3212_v34 = vpop.f32.mrf.mxu0 }
 0x7ca   :  { %v3758_v44 = vmax.f32 %v1102_v38, 0.0 }
 0x7cb   :  { %v1106_v37 = vpop.f32.mrf.mxu0 }
 0x7cc   :  { %v1107_v39 = vadd.f32 %v2857_v36, %v1106_v37 }
 0x7cd   :  { %v3215_v40 = vpop.f32.mrf.mxu0 }
 0x7ce   :  { %v3756_v42 = vmax.f32 %v1107_v39, 0.0 }
 0x7d0   :  { %3216 = vmatprep.subr.mxu1 %v3756_v42 }
 0x7d1   :  { %3217 = vmatpush3.msra.mxu1 %v3756_v42 }
 0x7d2   :  { %3218 = vmatprep.subr.mxu1 %v3758_v44 }
 0x7d3   :  { %3219 = vmatpush3.msra.mxu1 %v3758_v44 }
 0x7d4   :  { %3220 = vmatprep.subr.mxu1 %v3762_v45 }
 0x7d5   :  { %3221 = vmatpush3.msra.mxu1 %v3762_v45 }
 0x7d6   :  { %3223 = vmatmul.mubr.msk.f32.vlgmr.msra.gmra.mxu1 %vm236_vm6, %v3615_v5  ;;  %3282 = vmatprep.subr.mxu1 %v3514_v0 }
 0x7d7   :  { %3225 = vmatprep.mubr.msk.f32.mxu1 %vm236_vm6, %v3619_v7 }
 0x7da   :  { %3226 = vmatmul.mubr.msk.f32.gmra.mxu1 %vm236_vm6, %v3626_v8 }
 0x7db   :  { %3228 = vmatprep.mubr.msk.f32.mxu1 %vm236_vm6, %v3630_v9 }
 0x7de   :  { %3229 = vmatmul.mubr.msk.f32.gmra.mxu1 %vm236_vm6, %v3634_v10 }
 0x7df   :  { %3231 = vmatprep.mubr.msk.f32.mxu1 %vm236_vm6, %v226_v35 }
 0x7e2   :  { %3232 = vmatmul.mubr.msk.f32.gmra.mxu1 %vm236_vm6, %v227_v43  ;;  %v2880_v43 = vld [vmem:[#allocation2 + $0x190] ss:$0 sm:$0xff] }
 0x7e3   :  { %3234 = vmatprep.mubr.msk.f32.mxu1 %vm236_vm6, %v228_v46 }
 0x7e6   :  { %3235 = vmatmul.mubr.msk.f32.gmra.mxu1 %vm236_vm6, %v229_v47 }
 0x7e7   :  { %3237 = vmatprep.mubr.msk.f32.mxu1 %vm236_vm6, %v230_v48 }
 0x7ea   :  { %3238 = vmatmul.mubr.msk.f32.gmra.mxu1 %vm236_vm6, %v231_v50 }
 0x7eb   :  { %3298 = vmatprep.mubr.msk.f32.mxu1 %vm3515_vm0, %v3514_v0 }
 0x896   :  { %v3224_v59 = vpop.f32.mrf.mxu1 }
 0x898   :  { %v1197_v62 = vpop.f32.mrf.mxu1 }
 0x89a   :  { %v3227_v63 = vpop.f32.mrf.mxu1 }
 0x89c   :  { %v1207_v3 = vpop.f32.mrf.mxu1 }
 0x89e   :  { %v3230_v4 = vpop.f32.mrf.mxu1 }
 0x8a0   :  { %v1217_v6 = vpop.f32.mrf.mxu1 }
 0x8a2   :  { %v3233_v11 = vpop.f32.mrf.mxu1 }
 0x8a3   :  { %1264 = vrot.lane.b32.xlu1 %v3233_v11, %s3518_s27 }
 0x8a4   :  { %v1227_v12 = vpop.f32.mrf.mxu1 }
 0x8a6   :  { %v3236_v13 = vpop.f32.mrf.mxu1 }
 0x8a7   :  { %1262 = vrot.lane.b32.xlu1 %v1227_v12, %s3518_s27 }
 0x8a8   :  { %v1237_v14 = vpop.f32.mrf.mxu1 }
 0x8aa   :  { %v3239_v15 = vpop.f32.mrf.mxu1 }
 0x8ab   :  { %1268 = vrot.lane.b32.xlu1 %v3236_v13, %s3518_s27 }
 0x8ac   :  { %v1247_v16 = vpop.f32.mrf.mxu1 }
 0x8af   :  { %1266 = vrot.lane.b32.xlu1 %v1237_v14, %s3518_s27 }
 0x8b3   :  { %1270 = vrot.lane.b32.xlu1 %v1247_v16, %s3518_s27 }
 0x8b7   :  { %1272 = vrot.lane.b32.xlu1 %v3239_v15, %s3518_s27 }
 0x915   :  { %v1265_v17 = vpop.permute.xlu1 %1264 }
 0x916   :  { %v1281_v24 = vsel %vm457_vm7, %v3224_v59, %v1265_v17 }
 0x919   :  { %v1263_v18 = vpop.permute.xlu1 %1262 }
 0x91a   :  { %v1280_v22 = vsel %vm457_vm7, %v1197_v62, %v1263_v18 }
 0x91b   :  { %3256 = vmatprep.mubr.msk.f32.mxu0 %vm1299_vm8, %v1280_v22 }
 0x91c   :  { %3257 = vmatmul.mubr.msk.f32.vlgmr.msra.gmra.mxu0 %vm1299_vm8, %v1281_v24 }
 0x91d   :  { %v1269_v26 = vpop.permute.xlu1 %1268  ;;  %3266 = vmatpush3.msra.mxu0 %v1488_v23 }
 0x91e   :  { %3267 = vmatprep.subr.mxu0 %v3514_v0  ;;  %v1283_v31 = vsel %vm457_vm7, %v3227_v63, %v1269_v26 }
 0x91f   :  { %3268 = vmatpush3.msra.mxu0 %v1487_v25 }
 0x920   :  { %3269 = vmatprep.subr.mxu0 %v3514_v0 }
 0x921   :  { %v1267_v29 = vpop.permute.xlu1 %1266  ;;  %3270 = vmatpush3.msra.mxu0 %v1486_v27 }
 0x922   :  { %v1282_v30 = vsel %vm457_vm7, %v1207_v3, %v1267_v29  ;;  %3271 = vmatprep.subr.mxu0 %v3514_v0 }
 0x923   :  { %3259 = vmatprep.mubr.msk.f32.mxu0 %vm1299_vm8, %v1282_v30  ;;  %3272 = vmatpush3.msra.mxu0 %v1485_v28 }
 0x924   :  { %3260 = vmatmul.mubr.msk.f32.gmra.mxu0 %vm1299_vm8, %v1283_v31  ;;  %3307 = vmatprep.subr.mxu0 %v3514_v0 }
 0x925   :  { %v1271_v32 = vpop.permute.xlu1 %1270 }
 0x926   :  { %v1284_v33 = vsel %vm457_vm7, %v1217_v6, %v1271_v32 }
 0x927   :  { %3262 = vmatprep.mubr.msk.f32.mxu0 %vm1299_vm8, %v1284_v33 }
 0x929   :  { %v1273_v34 = vpop.permute.xlu1 %1272 }
 0x92a   :  { %v1285_v35 = vsel %vm457_vm7, %v3230_v4, %v1273_v34  ;;  %v3520_v4 = vmov 0  }
 0x92b   :  { %3263 = vmatmul.mubr.msk.f32.gmra.mxu0 %vm1299_vm8, %v1285_v35  ;;  %3414 = vset.pattern.permute.xlu1 %v3520_v4 }
 0x92c   :  { %3273 = vmatprep.mubr.msk.f32.mxu0 %vm3515_vm0, %v3514_v0  ;;  %3415 = vset.pattern.permute.xlu0 %v3520_v4 }
 0x92f   :  { %3274 = vmatmul.mubr.msk.f32.vlgmr.msra.gmra.mxu0 %vm457_vm7, %v3762_v45 }
 0x930   :  { %3276 = vmatprep.mubr.msk.f32.mxu0 %vm3515_vm0, %v3514_v0 }
 0x933   :  { %3277 = vmatmul.mubr.msk.f32.gmra.mxu0 %vm457_vm7, %v3758_v44 }
 0x934   :  { %3279 = vmatprep.mubr.msk.f32.mxu0 %vm3515_vm0, %v3514_v0 }
 0x937   :  { %3280 = vmatmul.mubr.msk.f32.gmra.mxu0 %vm457_vm7, %v3756_v42 }
 0x938   :  { %3319 = vmatprep.mubr.msk.f32.mxu0 %vm3515_vm0, %v3514_v0 }
 0x9dc   :  { %v3258_v36 = vpop.f32.mrf.mxu0 }
 0x9dd   :  { %v1390_v2 = vadd.f32 %v3258_v36, %v2873_v53 }
 0x9de   :  { %v1384_v37 = vpop.f32.mrf.mxu0 }
 0x9df   :  { %v1385_v3 = vadd.f32 %v2873_v53, %v1384_v37 }
 0x9e4   :  { %v3261_v38 = vpop.f32.mrf.mxu0 }
 0x9e5   :  { %v1400_v62 = vadd.f32 %v3261_v38, %v2873_v53 }
 0x9e6   :  { %v1394_v39 = vpop.f32.mrf.mxu0 }
 0x9e7   :  { %v1395_v63 = vadd.f32 %v2873_v53, %v1394_v39 }
 0x9eb   :  { %v3264_v40 = vpop.f32.mrf.mxu0 }
 0x9ec   :  { %v1410_v56 = vadd.f32 %v3264_v40, %v2873_v53 }
 0x9ed   :  { %v1404_v41 = vpop.f32.mrf.mxu0 }
 0x9ee   :  { %v1405_v61 = vadd.f32 %v2873_v53, %v1404_v41 }
 0x9ef   :  { %v1569_v46 = vpop.f32.mrf.mxu0 }
 0x9f0   :  { %v1570_v47 = vadd.f32 %v2880_v43, %v1569_v46 }
 0x9f1   :  { %v3275_v48 = vpop.f32.mrf.mxu0 }
 0x9f2   :  { %1586 = vrot.lane.b32.xlu1 %v1570_v47, %s3519_s28 }
 0x9f3   :  { %v1574_v50 = vpop.f32.mrf.mxu0 }
 0x9f4   :  { %v1575_v51 = vadd.f32 %v2880_v43, %v1574_v50 }
 0x9f5   :  { %v3278_v52 = vpop.f32.mrf.mxu0 }
 0x9f6   :  { %1588 = vrot.lane.b32.xlu1 %v1575_v51, %s3519_s28 }
 0x9f7   :  { %v1579_v54 = vpop.f32.mrf.mxu0 }
 0x9f8   :  { %v1580_v59 = vadd.f32 %v2880_v43, %v1579_v54 }
 0x9f9   :  { %v3281_v60 = vpop.f32.mrf.mxu0 }
 0x9fa   :  { %1429 = vrot.lane.b32.xlu1 %v1410_v56, %s3519_s28  ;;  %1590 = vrot.lane.b32.xlu0 %v1580_v59, %s3519_s28 }
 0x9fe   :  { %1427 = vrot.lane.b32.xlu1 %v1405_v61, %s3519_s28 }
 0xa02   :  { %1425 = vrot.lane.b32.xlu1 %v1400_v62, %s3519_s28 }
 0xa06   :  { %1423 = vrot.lane.b32.xlu1 %v1395_v63, %s3519_s28 }
 0xa0a   :  { %1421 = vrot.lane.b32.xlu1 %v1390_v2, %s3519_s28 }
 0xa0e   :  { %1419 = vrot.lane.b32.xlu1 %v1385_v3, %s3519_s28 }
 0xa64   :  { %v1587_v6 = vpop.permute.xlu1 %1586 }
 0xa65   :  { %v1595_v11 = vsub.f32 %v1570_v47, %v1587_v6 }
 0xa67   :  { %v1598_v12 = vsub.f32 0.0, %v1595_v11 }
 0xa68   :  { %v1589_v13 = vpop.permute.xlu1 %1588 }
 0xa69   :  { %v1601_v14 = vmul.f32 1.442695, %v1598_v12  ;;  %v1596_v15 = vsub.f32 %v1575_v51, %v1589_v13 }
 0xa6b   :  { %3426 = vpow2.f32 %v1601_v14  ;;  %v1599_v16 = vsub.f32 0.0, %v1596_v15 }
 0xa6c   :  { %v1430_v17 = vpop.permute.xlu1 %1429  ;;  %v1591_v18 = vpop.permute.xlu0 %1590 }
 0xa6d   :  { %v1603_v22 = vmul.f32 1.442695, %v1599_v16  ;;  %v1442_v23 = vsub.f32 %v1410_v56, %v1430_v17  ;;  %v1597_v24 = vsub.f32 %v1580_v59, %v1591_v18 }
 0xa6f   :  { %3428 = vpow2.f32 %v1603_v22  ;;  %v1448_v25 = vsub.f32 0.0, %v1442_v23  ;;  %v1600_v26 = vsub.f32 0.0, %v1597_v24 }
 0xa70   :  { %v1428_v27 = vpop.permute.xlu1 %1427 }
 0xa71   :  { %v1459_v28 = vmul.f32 1.442695, %v1448_v25  ;;  %v1605_v29 = vmul.f32 1.442695, %v1600_v26  ;;  %v1441_v30 = vsub.f32 %v1405_v61, %v1428_v27 }
 0xa73   :  { %3430 = vpow2.f32 %v1459_v28  ;;  %v1447_v31 = vsub.f32 0.0, %v1441_v30 }
 0xa74   :  { %3432 = vpow2.f32 %v1605_v29  ;;  %v1426_v32 = vpop.permute.xlu1 %1425 }
 0xa75   :  { %v1457_v33 = vmul.f32 1.442695, %v1447_v31  ;;  %v1440_v34 = vsub.f32 %v1400_v62, %v1426_v32 }
 0xa77   :  { %3434 = vpow2.f32 %v1457_v33  ;;  %v1446_v35 = vsub.f32 0.0, %v1440_v34 }
 0xa78   :  { %v3427_v36 = vpop.eup %3426  ;;  %v1424_v37 = vpop.permute.xlu1 %1423 }
 0xa79   :  { %v1607_v38 = vadd.f32 1.0, %v3427_v36  ;;  %v1455_v39 = vmul.f32 1.442695, %v1446_v35  ;;  %v1439_v40 = vsub.f32 %v1395_v63, %v1424_v37 }
 0xa7b   :  { %3436 = vrcp.f32 %v1607_v38  ;;  %v1445_v41 = vsub.f32 0.0, %v1439_v40  ;;  %v1758_v40 = vld [vmem:[#allocation2 + $0x118] sm:$0xff] }
 0xa7c   :  { %v3429_v43 = vpop.eup %3428  ;;  %3438 = vpow2.f32 %v1455_v39  ;;  %v1422_v46 = vpop.permute.xlu1 %1421  ;;  %v1759_v39 = vld [vmem:[#allocation2 + $0x120] sm:$0xff] }
 0xa7d   :  { %v1608_v47 = vadd.f32 1.0, %v3429_v43  ;;  %v1453_v48 = vmul.f32 1.442695, %v1445_v41  ;;  %v1438_v50 = vsub.f32 %v1390_v2, %v1422_v46  ;;  %3283 = vmatpush3.msra.mxu1 %v1759_v39  ;;  %v1757_v41 = vld [vmem:[#allocation2 + $0x110] sm:$0xff]  ;;  %v1756_v43 = vld [vmem:[#allocation2 + $0x108] sm:$0xff]  ;;  %v1755_v46 = vld [vmem:[#allocation2 + $0x100] sm:$0xff] }
 0xa7e   :  { %3284 = vmatprep.subr.mxu1 %v3514_v0 }
 0xa7f   :  { %3440 = vrcp.f32 %v1608_v47  ;;  %v1444_v51 = vsub.f32 0.0, %v1438_v50  ;;  %3285 = vmatpush3.msra.mxu1 %v1758_v40  ;;  %v1754_v47 = vld [vmem:[#allocation2 + $0xf8] sm:$0xff] }
 0xa80   :  { %v3431_v52 = vpop.eup %3430  ;;  %3442 = vpow2.f32 %v1453_v48  ;;  %v1420_v53 = vpop.permute.xlu1 %1419  ;;  %3286 = vmatprep.subr.mxu1 %v3514_v0  ;;  %v1753_v48 = vld [vmem:[#allocation2 + $0xf0] sm:$0xff] }
 0xa81   :  { %v3433_v54 = vpop.eup %3432  ;;  %v1451_v56 = vmul.f32 1.442695, %v1444_v51  ;;  %v1437_v59 = vsub.f32 %v1385_v3, %v1420_v53  ;;  %v1466_v60 = vadd.f32 1.0, %v3431_v52  ;;  %3287 = vmatpush3.msra.mxu1 %v1757_v41 }
 0xa82   :  { %v1609_v61 = vadd.f32 1.0, %v3433_v54  ;;  %3288 = vmatprep.subr.mxu1 %v3514_v0 }
 0xa83   :  { %v1443_v62 = vsub.f32 0.0, %v1437_v59  ;;  %3289 = vmatpush3.msra.mxu1 %v1756_v43 }
 0xa84   :  { %v3435_v63 = vpop.eup %3434  ;;  %3444 = vrcp.f32 %v1609_v61  ;;  %3290 = vmatprep.subr.mxu1 %v3514_v0 }
 0xa85   :  { %3446 = vpow2.f32 %v1451_v56  ;;  %v1449_v6 = vmul.f32 1.442695, %v1443_v62  ;;  %v1465_v11 = vadd.f32 1.0, %v3435_v63  ;;  %3291 = vmatpush3.msra.mxu1 %v1755_v46 }
 0xa86   :  { %3448 = vrcp.f32 %v1466_v60  ;;  %3292 = vmatprep.subr.mxu1 %v3514_v0 }
 0xa87   :  { %3450 = vpow2.f32 %v1449_v6  ;;  %3293 = vmatpush3.msra.mxu1 %v1754_v47 }
 0xa88   :  { %v3437_v12 = vpop.eup %3436  ;;  %3452 = vrcp.f32 %v1465_v11  ;;  %3294 = vmatprep.subr.mxu1 %v3514_v0 }
 0xa89   :  { %v3439_v2 = vpop.eup %3438  ;;  %v1616_v13 = vsub.f32 1.0, %v3437_v12  ;;  %3295 = vmatpush3.msra.mxu1 %v1753_v48 }
 0xa8a   :  { %v1464_v14 = vadd.f32 1.0, %v3439_v2  ;;  %3296 = vmatprep.subr.mxu1 %v3514_v0 }
 0xa8b   :  { %1639 = vperm.xlu1 %3414, %v1616_v13  }
 0xa8c   :  { %v3441_v15 = vpop.eup %3440  ;;  %3454 = vrcp.f32 %v1464_v14 }
 0xa8d   :  { %v3443_v16 = vpop.eup %3442  ;;  %v1617_v17 = vsub.f32 1.0, %v3441_v15 }
 0xa8e   :  { %v1463_v3 = vadd.f32 1.0, %v3443_v16 }
 0xa8f   :  { %1644 = vperm.xlu1 %3414, %v1617_v17  }
 0xa90   :  { %3456 = vrcp.f32 %v1463_v3 }
 0xa91   :  { %v3445_v18 = vpop.eup %3444 }
 0xa92   :  { %v3447_v22 = vpop.eup %3446  ;;  %v1618_v23 = vsub.f32 1.0, %v3445_v18 }
 0xa93   :  { %v3826_v24 = vpop.eup %3448  ;;  %v1462_v25 = vadd.f32 1.0, %v3447_v22 }
 0xa94   :  { %1649 = vperm.xlu1 %3414, %v1618_v23   ;;  %v3451_v26 = vpop.eup %3450  ;;  %v1484_v28 = vsub.f32 1.0, %v3826_v24 }
 0xa95   :  { %3458 = vrcp.f32 %v1462_v25  ;;  %v1461_v27 = vadd.f32 1.0, %v3451_v26  ;;  %v3829_v29 = vpop.eup %3452 }
 0xa96   :  { %v1483_v30 = vsub.f32 1.0, %v3829_v29 }
 0xa97   :  { %3460 = vrcp.f32 %v1461_v27 }
 0xa98   :  { %1865 = vrot.lane.b32.xlu1 %v1484_v28, %s3521_s29 }
 0xa99   :  { %v3834_v31 = vpop.eup %3454 }
 0xa9a   :  { %v1482_v32 = vsub.f32 1.0, %v3834_v31 }
 0xa9c   :  { %1863 = vrot.lane.b32.xlu1 %v1483_v30, %s3521_s29 }
 0xa9d   :  { %v3839_v33 = vpop.eup %3456 }
 0xa9e   :  { %v1481_v34 = vsub.f32 1.0, %v3839_v33 }
 0xaa0   :  { %1861 = vrot.lane.b32.xlu1 %v1482_v32, %s3521_s29 }
 0xaa2   :  { %v3844_v35 = vpop.eup %3458 }
 0xaa3   :  { %v1480_v36 = vsub.f32 1.0, %v3844_v35 }
 0xaa4   :  { %1859 = vrot.lane.b32.xlu1 %v1481_v34, %s3521_s29  ;;  %v3849_v37 = vpop.eup %3460 }
 0xaa5   :  { %v1479_v38 = vsub.f32 1.0, %v3849_v37 }
 0xaa8   :  { %1857 = vrot.lane.b32.xlu1 %v1480_v36, %s3521_s29 }
 0xaac   :  { %1855 = vrot.lane.b32.xlu1 %v1479_v38, %s3521_s29 }
 0xab0   :  { %1621 = vperm.xlu1 %3414, %v3437_v12  }
 0xab4   :  { %1626 = vperm.xlu1 %3414, %v3441_v15  }
 0xab8   :  { %1631 = vperm.xlu1 %3414, %v3445_v18  }
 0xb06   :  { %v1640_v50 = vpop.permute.xlu1 %1639 }
 0xb07   :  { %v3864_v51 = vmul.f32 %v1640_v50, %v3762_v45 }
 0xb09   :  { %v1708_v56 = vmul.f32 %v3864_v51, %v3864_v51  ;;  %v1696_v61 = vsel %vm457_vm7, %v3864_v51, 0.0 }
 0xb0a   :  { %v1645_v52 = vpop.permute.xlu1 %1644 }
 0xb0b   :  { %v3867_v53 = vmul.f32 %v1645_v52, %v3758_v44  ;;  %v1711_v11 = vsel %vm457_vm7, %v1708_v56, 0.0 }
 0xb0d   :  { %v1709_v54 = vmul.f32 %v3867_v53, %v3867_v53  ;;  %v1697_v59 = vsel %vm457_vm7, %v3867_v53, 0.0 }
 0xb0e   :  { %v1698_v6 = vadd.f32 %v1697_v59, %v1696_v61 }
 0xb0f   :  { %v1650_v60 = vpop.permute.xlu1 %1649  ;;  %v1712_v62 = vsel %vm457_vm7, %v1709_v54, 0.0 }
 0xb10   :  { %v3879_v63 = vmul.f32 %v1650_v60, %v3756_v42  ;;  %v1713_v13 = vadd.f32 %v1712_v62, %v1711_v11 }
 0xb12   :  { %v1699_v12 = vsel %vm457_vm7, %v3879_v63, 0.0  ;;  %v1710_v2 = vmul.f32 %v3879_v63, %v3879_v63 }
 0xb13   :  { %v1700_v14 = vadd.f32 %v1699_v12, %v1698_v6  ;;  %v1866_v15 = vpop.permute.xlu1 %1865 }
 0xb14   :  { %v1714_v16 = vsel %vm457_vm7, %v1710_v2, 0.0  ;;  %v1879_v17 = vsel %vm1873_vm9, %v3826_v24, %v1866_v15 }
 0xb15   :  { %v1701_v3 = vrot.slane %v1700_v14, 4  ;;  %v1715_v18 = vadd.f32 %v1714_v16, %v1713_v13  ;;  %3308 = vmatpush3.msra.mxu0 %v1879_v17  ;;  %v1752_v16 = vld [vmem:[#allocation2 + $0xe8] sm:$0xff] }
 0xb16   :  { %3309 = vmatprep.subr.mxu0 %v3514_v0  ;;  %3297 = vmatpush3.msra.mxu1 %v1752_v16 }
 0xb17   :  { %v1702_v22 = vadd.f32 %v1701_v3, %v1700_v14  ;;  %v1716_v23 = vrot.slane %v1715_v18, 4  ;;  %v1864_v25 = vpop.permute.xlu1 %1863 }
 0xb18   :  { %v1878_v26 = vsel %vm1873_vm9, %v3829_v29, %v1864_v25 }
 0xb19   :  { %v1703_v27 = vrot.slane %v1702_v22, 2  ;;  %v1717_v39 = vadd.f32 %v1716_v23, %v1715_v18  ;;  %3310 = vmatpush3.msra.mxu0 %v1878_v26 }
 0xb1a   :  { %3311 = vmatprep.subr.mxu0 %v3514_v0 }
 0xb1b   :  { %v1704_v40 = vadd.f32 %v1703_v27, %v1702_v22  ;;  %v1718_v41 = vrot.slane %v1717_v39, 2  ;;  %v1862_v43 = vpop.permute.xlu1 %1861 }
 0xb1c   :  { %v1877_v46 = vsel %vm1873_vm9, %v3834_v31, %v1862_v43 }
 0xb1d   :  { %v1705_v47 = vrot.slane %v1704_v40, 1  ;;  %v1719_v48 = vadd.f32 %v1718_v41, %v1717_v39  ;;  %3312 = vmatpush3.msra.mxu0 %v1877_v46 }
 0xb1e   :  { %3313 = vmatprep.subr.mxu0 %v3514_v0 }
 0xb1f   :  { %v1706_v50 = vadd.f32 %v1705_v47, %v1704_v40  ;;  %v1720_v52 = vrot.slane %v1719_v48, 1  ;;  %v1860_v54 = vpop.permute.xlu1 %1859 }
 0xb20   :  { %v1876_v56 = vsel %vm1873_vm9, %v3839_v33, %v1860_v54 }
 0xb21   :  { %v1707_v59 = vmul.f32 0.041666668, %v1706_v50  ;;  %v1721_v60 = vadd.f32 %v1720_v52, %v1719_v48  ;;  %3314 = vmatpush3.msra.mxu0 %v1876_v56 }
 0xb22   :  { %3315 = vmatprep.subr.mxu0 %v3514_v0 }
 0xb23   :  { %v1722_v61 = vmul.f32 0.041666668, %v1721_v60  ;;  %v1723_v62 = vmul.f32 %v1707_v59, %v1707_v59  ;;  %v1858_v6 = vpop.permute.xlu1 %1857  ;;  %v1726_v17 = vsub.f32 %v3864_v51, %v1707_v59  ;;  %v1728_v18 = vsub.f32 %v3879_v63, %v1707_v59 }
 0xb24   :  { %v1875_v11 = vsel %vm1873_vm9, %v3844_v35, %v1858_v6 }
 0xb25   :  { %v1724_v12 = vsub.f32 %v1722_v61, %v1723_v62  ;;  %3316 = vmatpush3.msra.mxu0 %v1875_v11 }
 0xb26   :  { %3317 = vmatprep.subr.mxu0 %v3514_v0 }
 0xb27   :  { %v1725_v2 = vmax.f32 %v1724_v12, 0.0  ;;  %v1856_v13 = vpop.permute.xlu1 %1855 }
 0xb28   :  { %v1874_v14 = vsel %vm1873_vm9, %v3849_v37, %v1856_v13 }
 0xb29   :  { %v1729_v15 = vadd.f32 1e-05, %v1725_v2  ;;  %3318 = vmatpush3.msra.mxu0 %v1874_v14 }
 0xb2a   :  { %3320 = vmatmul.mubr.msk.f32.vlgmr.msra.gmra.mxu0 %vm32_vm2, %v3590_v55  ;;  %3343 = vmatprep.subr.mxu0 %v3514_v0  ;;  %v1727_v55 = vsub.f32 %v3867_v53, %v1707_v59 }
 0xb2b   :  { %3462 = vrsqrt.f32 %v1729_v15  ;;  %3322 = vmatprep.mubr.msk.f32.mxu0 %vm3515_vm0, %v3514_v0  ;;  %v1622_v27 = vpop.permute.xlu1 %1621 }
 0xb2c   :  { %v1634_v40 = vmul.f32 %v1622_v27, %v3762_v45 }
 0xb2e   :  { %3323 = vmatmul.mubr.msk.f32.gmra.mxu0 %vm32_vm2, %v3596_v57  ;;  %v1655_v46 = vsel %vm457_vm7, %v1634_v40, 0.0  ;;  %v1667_v47 = vmul.f32 %v1634_v40, %v1634_v40 }
 0xb2f   :  { %3325 = vmatprep.mubr.msk.f32.mxu0 %vm3515_vm0, %v3514_v0  ;;  %v1627_v39 = vpop.permute.xlu1 %1626 }
 0xb30   :  { %v1635_v51 = vmul.f32 %v1627_v39, %v3758_v44  ;;  %v1670_v59 = vsel %vm457_vm7, %v1667_v47, 0.0 }
 0xb32   :  { %3326 = vmatmul.mubr.msk.f32.gmra.mxu0 %vm32_vm2, %v3601_v58  ;;  %v1656_v41 = vsel %vm457_vm7, %v1635_v51, 0.0  ;;  %v1668_v43 = vmul.f32 %v1635_v51, %v1635_v51 }
 0xb33   :  { %3355 = vmatprep.mubr.msk.f32.mxu0 %vm3515_vm0, %v3514_v0  ;;  %v1632_v53 = vpop.permute.xlu1 %1631  ;;  %v1657_v52 = vadd.f32 %v1656_v41, %v1655_v46 }
 0xb34   :  { %v1636_v63 = vmul.f32 %v1632_v53, %v3756_v42  ;;  %v1671_v54 = vsel %vm457_vm7, %v1668_v43, 0.0 }
 0xb35   :  { %v1672_v45 = vadd.f32 %v1671_v54, %v1670_v59 }
 0xb36   :  { %v1658_v48 = vsel %vm457_vm7, %v1636_v63, 0.0  ;;  %v1669_v50 = vmul.f32 %v1636_v63, %v1636_v63 }
 0xb37   :  { %v1659_v56 = vadd.f32 %v1658_v48, %v1657_v52 }
 0xb38   :  { %v3463_v3 = vpop.eup %3462  ;;  %v1673_v44 = vsel %vm457_vm7, %v1669_v50, 0.0 }
 0xb39   :  { %v1732_v22 = vmul.f32 %v3463_v3, %v1727_v55  ;;  %v1731_v57 = vmul.f32 %v3463_v3, %v1726_v17  ;;  %v1733_v26 = vmul.f32 %v3463_v3, %v1728_v18  ;;  %v1660_v60 = vrot.slane %v1659_v56, 4 }
 0xb3a   :  { %v1674_v42 = vadd.f32 %v1673_v44, %v1672_v45 }
 0xb3b   :  { %v1735_v23 = vadd.f32 0.0001, %v1732_v22  ;;  %v1734_v25 = vadd.f32 0.0001, %v1731_v57  ;;  %v1736_v58 = vadd.f32 0.0001, %v1733_v26  ;;  %v1661_v61 = vadd.f32 %v1660_v60, %v1659_v56 }
 0xb3c   :  { %v1675_v62 = vrot.slane %v1674_v42, 4 }
 0xb3d   :  { %1742 = vrot.lane.b32.xlu0 %v1735_v23, %s3518_s27  ;;  %1740 = vrot.lane.b32.xlu1 %v1734_v25, %s3518_s27  ;;  %v1662_v6 = vrot.slane %v1661_v61, 2 }
 0xb3e   :  { %v1676_v11 = vadd.f32 %v1675_v62, %v1674_v42 }
 0xb3f   :  { %v1663_v12 = vadd.f32 %v1662_v6, %v1661_v61 }
 0xb40   :  { %v1677_v2 = vrot.slane %v1676_v11, 2 }
 0xb41   :  { %1744 = vrot.lane.b32.xlu1 %v1736_v58, %s3518_s27  ;;  %v1664_v13 = vrot.slane %v1663_v12, 1 }
 0xb42   :  { %v1678_v14 = vadd.f32 %v1677_v2, %v1676_v11  ;;  %v3522_v2 = vmov 1  }
 0xb43   :  { %v1665_v15 = vadd.f32 %v1664_v13, %v1663_v12 }
 0xb44   :  { %v1679_v16 = vrot.slane %v1678_v14, 1 }
 0xb45   :  { %v1666_v55 = vmul.f32 0.041666668, %v1665_v15 }
 0xb46   :  { %v1680_v17 = vadd.f32 %v1679_v16, %v1678_v14 }
 0xb47   :  { %v1682_v18 = vmul.f32 %v1666_v55, %v1666_v55  ;;  %v1685_v26 = vsub.f32 %v1634_v40, %v1666_v55  ;;  %v1686_v27 = vsub.f32 %v1635_v51, %v1666_v55  ;;  %v1687_v43 = vsub.f32 %v1636_v63, %v1666_v55 }
 0xb48   :  { %v1681_v3 = vmul.f32 0.041666668, %v1680_v17 }
 0xb4a   :  { %v1683_v22 = vsub.f32 %v1681_v3, %v1682_v18 }
 0xb4c   :  { %v1684_v57 = vmax.f32 %v1683_v22, 0.0 }
 0xb4e   :  { %v1688_v23 = vadd.f32 1e-05, %v1684_v57 }
 0xb50   :  { %3464 = vrsqrt.f32 %v1688_v23 }
 0xb5d   :  { %v3465_v25 = vpop.eup %3464 }
 0xb5e   :  { %v1690_v58 = vmul.f32 %v3465_v25, %v1685_v26  ;;  %v1691_v39 = vmul.f32 %v3465_v25, %v1686_v27  ;;  %v1692_v50 = vmul.f32 %v3465_v25, %v1687_v43 }
 0xb60   :  { %v1693_v53 = vadd.f32 0.0001, %v1690_v58  ;;  %v1694_v48 = vadd.f32 0.0001, %v1691_v39  ;;  %v1695_v51 = vadd.f32 0.0001, %v1692_v50 }
 0xbaf   :  { %v1741_v41 = vpop.permute.xlu1 %1740  ;;  %v1743_v47 = vpop.permute.xlu0 %1742 }
 0xbb0   :  { %v1749_v46 = vsel %vm457_vm7, %v1693_v53, %v1741_v41  ;;  %v1750_v52 = vsel %vm457_vm7, %v1694_v48, %v1743_v47 }
 0xbb1   :  { %3299 = vmatmul.mubr.msk.f32.vlgmr.msra.gmra.mxu1 %vm1299_vm8, %v1749_v46 }
 0xbb2   :  { %3301 = vmatprep.mubr.msk.f32.mxu1 %vm3515_vm0, %v3514_v0 }
 0xbb3   :  { %v1745_v54 = vpop.permute.xlu1 %1744 }
 0xbb4   :  { %v1751_v40 = vsel %vm457_vm7, %v1695_v51, %v1745_v54 }
 0xbb5   :  { %3302 = vmatmul.mubr.msk.f32.gmra.mxu1 %vm1299_vm8, %v1750_v52 }
 0xbb6   :  { %3304 = vmatprep.mubr.msk.f32.mxu1 %vm3515_vm0, %v3514_v0 }
 0xbb9   :  { %3305 = vmatmul.mubr.msk.f32.gmra.mxu1 %vm1299_vm8, %v1751_v40 }
 0xbba   :  { %3334 = vmatprep.mubr.msk.f32.mxu1 %vm236_vm6, %v3605_v1 }
 0xbea   :  { %v1952_v63 = vpop.f32.mrf.mxu0 }
 0xbeb   :  { %v1953_v45 = vadd.f32 1.0, %v1952_v63 }
 0xbec   :  { %v3321_v56 = vpop.f32.mrf.mxu0 }
 0xbee   :  { %v1957_v59 = vpop.f32.mrf.mxu0 }
 0xbef   :  { %v1958_v44 = vadd.f32 1.0, %v1957_v59  ;;  %v60_v59 = vsub.s32 3, %v3582_v49 }
 0xbf0   :  { %v3324_v60 = vpop.f32.mrf.mxu0 }
 0xbf1   :  { %3466 = vrsqrt.f32 %v1958_v44 }
 0xbf2   :  { %v1962_v42 = vpop.f32.mrf.mxu0  ;;  %3468 = vrsqrt.f32 %v1953_v45 }
 0xbf3   :  { %v1963_v61 = vadd.f32 1.0, %v1962_v42 }
 0xbf4   :  { %v3327_v62 = vpop.f32.mrf.mxu0 }
 0xbf5   :  { %3470 = vrsqrt.f32 %v1963_v61 }
 0xbfe   :  { %v3467_v6 = vpop.eup %3466 }
 0xbff   :  { %1976 = vperm.xlu1 %3414, %v3467_v6   ;;  %v3469_v11 = vpop.eup %3468 }
 0xc02   :  { %v3471_v12 = vpop.eup %3470 }
 0xc03   :  { %1971 = vperm.xlu1 %3414, %v3469_v11   ;;  %1981 = vperm.xlu0 %3415, %v3471_v12  }
 0xc07   :  { %3417 = vset.pattern.permute.xlu1 %v3522_v2  ;;  %3416 = vset.pattern.permute.xlu0 %v3522_v2 }
 0xc08   :  { %1993 = vperm.xlu1 %3417, %v3471_v12   ;;  %1989 = vperm.xlu0 %3416, %v3467_v6  }
 0xc0c   :  { %1985 = vperm.xlu1 %3417, %v3469_v11   ;;  %3418 = vset.pattern.permute.xlu0 %v3520_v4 }
 0xc0d   :  { %2026 = vperm.xlu0 %3418, %v3826_v24  }
 0xc10   :  { %3419 = vset.pattern.permute.xlu1 %v3520_v4 }
 0xc11   :  { %2050 = vperm.xlu1 %3419, %v1484_v28   ;;  %2046 = vperm.xlu0 %3418, %v1483_v30  }
 0xc15   :  { %2021 = vperm.xlu1 %3419, %v3829_v29   ;;  %2042 = vperm.xlu0 %3418, %v1482_v32  }
 0xc19   :  { %2016 = vperm.xlu1 %3419, %v3834_v31   ;;  %2038 = vperm.xlu0 %3418, %v1481_v34  }
 0xc1d   :  { %2011 = vperm.xlu1 %3419, %v3839_v33   ;;  %2034 = vperm.xlu0 %3418, %v1480_v36  }
 0xc21   :  { %2006 = vperm.xlu1 %3419, %v3844_v35   ;;  %2030 = vperm.xlu0 %3418, %v1479_v38  }
 0xc25   :  { %2001 = vperm.xlu1 %3419, %v3849_v37  }
 0xc71   :  { %v3964_v1 = vpop.f32.mrf.mxu1 }
 0xc73   :  { %v3300_v4 = vpop.f32.mrf.mxu1 }
 0xc74   :  { %v53_v4 = vsub.s32 2, %v3582_v49 }
 0xc75   :  { %v3966_v24 = vpop.f32.mrf.mxu1 }
 0xc77   :  { %v3303_v28 = vpop.f32.mrf.mxu1 }
 0xc79   :  { %v3968_v29 = vpop.f32.mrf.mxu1 }
 0xc7a   :  { %v1977_v30 = vpop.permute.xlu1 %1976 }
 0xc7b   :  { %v3306_v31 = vpop.f32.mrf.mxu1 }
 0xc7e   :  { %v1982_v32 = vpop.permute.xlu0 %1981  ;;  %v1972_v33 = vpop.permute.xlu1 %1971 }
 0xc83   :  { %v1990_v34 = vpop.permute.xlu0 %1989  ;;  %v1994_v36 = vpop.permute.xlu1 %1993 }
 0xc84   :  { %v3971_v35 = vsel %vm457_vm7, %v1977_v30, %v1990_v34  ;;  %v3974_v38 = vsel %vm457_vm7, %v1982_v32, %v1994_v36 }
 0xc85   :  { %v2061_v37 = vmul.f32 %v3974_v38, %v3968_v29  ;;  %v2060_v14 = vmul.f32 %v3971_v35, %v3966_v24  ;;  %v2248_v61 = vmul.f32 %v3974_v38, %v3974_v38 }
 0xc87   :  { %3328 = vmatprep.subr.mxu1 %v2061_v37  ;;  %v1986_v13 = vpop.permute.xlu1 %1985 }
 0xc88   :  { %v3981_v15 = vsel %vm457_vm7, %v1972_v33, %v1986_v13  ;;  %3329 = vmatpush3.msra.mxu1 %v2061_v37  ;;  %v2027_v17 = vpop.permute.xlu0 %2026  ;;  %v2251_v33 = vmul.f32 %v2248_v61, %v3968_v29 }
 0xc89   :  { %3330 = vmatprep.subr.mxu1 %v2060_v14  ;;  %v2059_v16 = vmul.f32 %v3981_v15, %v3964_v1  ;;  %v2246_v62 = vmul.f32 %v3981_v15, %v3981_v15 }
 0xc8a   :  { %3331 = vmatpush3.msra.mxu1 %v2060_v14 }
 0xc8b   :  { %3332 = vmatprep.subr.mxu1 %v2059_v16  ;;  %v2249_v30 = vmul.f32 %v2246_v62, %v3964_v1 }
 0xc8c   :  { %3333 = vmatpush3.msra.mxu1 %v2059_v16  ;;  %v2051_v55 = vpop.permute.xlu1 %2050  ;;  %v2047_v3 = vpop.permute.xlu0 %2046 }
 0xc8d   :  { %3335 = vmatmul.mubr.msk.f32.vlgmr.msra.gmra.mxu1 %vm236_vm6, %v3615_v5  ;;  %3364 = vmatprep.subr.mxu1 %v3514_v0 }
 0xc8e   :  { %3337 = vmatprep.mubr.msk.f32.mxu1 %vm236_vm6, %v3619_v7 }
 0xc90   :  { %v2022_v5 = vpop.permute.xlu1 %2021  ;;  %v2043_v22 = vpop.permute.xlu0 %2042 }
 0xc91   :  { %3338 = vmatmul.mubr.msk.f32.gmra.mxu1 %vm236_vm6, %v3626_v8  ;;  %v2057_v39 = vsel %vm457_vm7, %v2022_v5, %v2047_v3 }
 0xc92   :  { %3340 = vmatprep.mubr.msk.f32.mxu1 %vm236_vm6, %v3630_v9  ;;  %v2058_v9 = vsel %vm457_vm7, %v2027_v17, %v2051_v55 }
 0xc94   :  { %v2017_v18 = vpop.permute.xlu1 %2016  ;;  %v2039_v8 = vpop.permute.xlu0 %2038 }
 0xc95   :  { %3341 = vmatmul.mubr.msk.f32.gmra.mxu1 %vm236_vm6, %v3634_v10  ;;  %v2056_v46 = vsel %vm457_vm7, %v2017_v18, %v2043_v22 }
 0xc96   :  { %3370 = vmatprep.mubr.msk.f32.mxu1 %vm3515_vm0, %v3514_v0 }
 0xc98   :  { %v2012_v23 = vpop.permute.xlu1 %2011  ;;  %v2035_v41 = vpop.permute.xlu0 %2034 }
 0xc99   :  { %v2055_v48 = vsel %vm457_vm7, %v2012_v23, %v2039_v8 }
 0xc9c   :  { %v2007_v27 = vpop.permute.xlu1 %2006  ;;  %v2031_v51 = vpop.permute.xlu0 %2030 }
 0xc9d   :  { %v2054_v54 = vsel %vm457_vm7, %v2007_v27, %v2035_v41 }
 0xca0   :  { %v2002_v50 = vpop.permute.xlu1 %2001 }
 0xca1   :  { %v2053_v63 = vsel %vm457_vm7, %v2002_v50, %v2031_v51 }
 0xd4d   :  { %v3336_v57 = vpop.f32.mrf.mxu1 }
 0xd4e   :  { %v2158_v40 = vmul.f32 %v3336_v57, %v2054_v54 }
 0xd4f   :  { %v2128_v7 = vpop.f32.mrf.mxu1 }
 0xd50   :  { %v2157_v56 = vmul.f32 %v2128_v7, %v2053_v63 }
 0xd51   :  { %v3339_v25 = vpop.f32.mrf.mxu1 }
 0xd52   :  { %v2160_v47 = vmul.f32 %v3339_v25, %v2056_v46 }
 0xd53   :  { %v2138_v26 = vpop.f32.mrf.mxu1 }
 0xd54   :  { %v2159_v52 = vmul.f32 %v2138_v26, %v2055_v48 }
 0xd55   :  { %v3342_v58 = vpop.f32.mrf.mxu1 }
 0xd56   :  { %v2162_v10 = vmul.f32 %v3342_v58, %v2058_v9 }
 0xd57   :  { %v2148_v53 = vpop.f32.mrf.mxu1 }
 0xd58   :  { %v2161_v43 = vmul.f32 %v2148_v53, %v2057_v39  ;;  %3344 = vmatpush3.msra.mxu0 %v2162_v10 }
 0xd59   :  { %3345 = vmatprep.subr.mxu0 %v3514_v0 }
 0xd5a   :  { %3346 = vmatpush3.msra.mxu0 %v2161_v43 }
 0xd5b   :  { %3347 = vmatprep.subr.mxu0 %v3514_v0 }
 0xd5c   :  { %3348 = vmatpush3.msra.mxu0 %v2160_v47 }
 0xd5d   :  { %3349 = vmatprep.subr.mxu0 %v3514_v0 }
 0xd5e   :  { %3350 = vmatpush3.msra.mxu0 %v2159_v52 }
 0xd5f   :  { %3351 = vmatprep.subr.mxu0 %v3514_v0 }
 0xd60   :  { %3352 = vmatpush3.msra.mxu0 %v2158_v40 }
 0xd61   :  { %3353 = vmatprep.subr.mxu0 %v3514_v0 }
 0xd62   :  { %3354 = vmatpush3.msra.mxu0 %v2157_v56 }
 0xd63   :  { %3356 = vmatmul.mubr.msk.f32.vlgmr.msra.gmra.mxu0 %vm32_vm2, %v3645_v19  ;;  %3378 = vmatprep.subr.mxu0 %v3514_v0  ;;  %v3488_v19 = vld [vmem:[%s4098_s0] sm:$0xf]  ;;  %s3523_s0 = smov 96  }
 0xd64   :  { %3358 = vmatprep.mubr.msk.f32.mxu0 %vm3515_vm0, %v3514_v0  ;;  %v61_v44 = vrot.slane %v3488_v19, %v60_v59  ;;  %v54_v13 = vrot.slane %v3488_v19, %v53_v4 }
 0xd66   :  { %vm62_vm10 = vcmp.eq.s32.totalorder %v3582_v49, %v61_v44  ;;  %vm55_vm11 = vcmp.eq.s32.totalorder %v3582_v49, %v54_v13  ;;  %v2541_v13 = vld [vmem:[#allocation2 + $0x130] sm:$0xff] }
 0xd67   :  { %3359 = vmatmul.mubr.msk.f32.gmra.mxu0 %vm32_vm2, %v3652_v20  ;;  %v2823_v20 = vsel %vm62_vm10, 1.0, %v3514_v0 }
 0xd68   :  { %3361 = vmatprep.mubr.msk.f32.mxu0 %vm3515_vm0, %v3514_v0  ;;  %2339 = vxpose.xlu1.b32.start.end [1/1] (short) (narrow) %v2823_v20, 8 }
 0xd6b   :  { %3362 = vmatmul.mubr.msk.f32.gmra.mxu0 %vm32_vm2, %v3660_v21  ;;  %v2247_v21 = vmul.f32 %v3971_v35, %v3971_v35 }
 0xd6c   :  { %3386 = vmatprep.mubr.msk.f32.mxu0 %vm3515_vm0, %v3514_v0 }
 0xd6d   :  { %v2250_v2 = vmul.f32 %v2247_v21, %v3966_v24 }
 0xde4   :  { %v2355_v49 = vpop.trf.xlu1 }
 0xe23   :  { %v2229_v45 = vpop.f32.mrf.mxu0 }
 0xe24   :  { %v2243_v12 = vmul.f32 %v2229_v45, %v3981_v15 }
 0xe25   :  { %v3357_v60 = vpop.f32.mrf.mxu0 }
 0xe26   :  { %v2252_v36 = vadd.f32 %v2249_v30, %v2243_v12 }
 0xe27   :  { %v2234_v42 = vpop.f32.mrf.mxu0 }
 0xe28   :  { %v2244_v6 = vmul.f32 %v2234_v42, %v3971_v35  ;;  %v2899_v35 = vld [vmem:[#allocation2 + $0x198] ss:$0 sm:$0xff] }
 0xe29   :  { %v3360_v11 = vpop.f32.mrf.mxu0  ;;  %v2260_v15 = vadd.f32 %v2899_v35, %v2252_v36  ;;  %v2543_v36 = vld [vmem:[#allocation2 + $0x140] sm:$0xff] }
 0xe2a   :  { %v2253_v31 = vadd.f32 %v2250_v2, %v2244_v6  ;;  %3379 = vmatpush3.msra.mxu0 %v2543_v36 }
 0xe2b   :  { %v2239_v28 = vpop.f32.mrf.mxu0  ;;  %v2263_v1 = vmax.f32 %v2260_v15, 0.0  ;;  %3380 = vmatprep.subr.mxu0 %v3514_v0 }
 0xe2c   :  { %v2245_v32 = vmul.f32 %v2239_v28, %v3974_v38  ;;  %v2261_v14 = vadd.f32 %v2899_v35, %v2253_v31  ;;  %v2822_v38 = vsel %vm55_vm11, 1.0, %v3514_v0 }
 0xe2d   :  { %v3363_v34 = vpop.f32.mrf.mxu0 }
 0xe2e   :  { %v2254_v37 = vadd.f32 %v2251_v33, %v2245_v32  ;;  %v2264_v24 = vmax.f32 %v2261_v14, 0.0 }
 0xe30   :  { %v2262_v16 = vadd.f32 %v2899_v35, %v2254_v37  ;;  %v2542_v37 = vld [vmem:[#allocation2 + $0x138] sm:$0xff]  ;;  %v2540_v35 = vld [vmem:[#allocation2 + $0x128] sm:$0xff] }
 0xe31   :  { %3381 = vmatpush3.msra.mxu0 %v2542_v37 }
 0xe32   :  { %v2265_v55 = vmax.f32 %v2262_v16, 0.0  ;;  %3382 = vmatprep.subr.mxu0 %v3514_v0 }
 0xe33   :  { %3383 = vmatpush3.msra.mxu0 %v2541_v13 }
 0xe34   :  { %3365 = vmatpush3.msra.mxu1 %v2265_v55  ;;  %3384 = vmatprep.subr.mxu0 %v3514_v0 }
 0xe35   :  { %3366 = vmatprep.subr.mxu1 %v3514_v0  ;;  %3385 = vmatpush3.msra.mxu0 %v2540_v35 }
 0xe36   :  { %3367 = vmatpush3.msra.mxu1 %v2264_v24 }
 0xe37   :  { %3368 = vmatprep.subr.mxu1 %v3514_v0 }
 0xe38   :  { %3369 = vmatpush3.msra.mxu1 %v2263_v1 }
 0xe39   :  { %3371 = vmatmul.mubr.msk.f32.vlgmr.msra.gmra.mxu1 %vm236_vm6, %v2822_v38  ;;  %3373 = vmatprep.subr.mxu1 %v3514_v0 }
 0xe3a   :  { %3375 = vmatprep.mubr.msk.f32.mxu1 %vm3515_vm0, %v3514_v0 }
 0xef9   :  { %v2335_v29 = vpop.f32.mrf.mxu1 }
 0xefa   :  { %v2453_v17 = vsel %vm2452_vm12, %v2335_v29, 0.0  ;;  %v2462_v5 = vmul.f32 %v2335_v29, %v2335_v29  ;;  %3374 = vmatpush3.msk.msra.mxu1 %vm2379_vm13, %v2335_v29  ;;  %2372 = vrot.lane.b32.xlu0 %v2335_v29, %s3523_s0  ;;  %v2480_v3 = vsel %vm2479_vm14, %v2335_v29, 0.0 }
 0xefb   :  { %v2454_v18 = vrot.slane %v2453_v17, 4  ;;  %3376 = vmatmul.mubr.msk.f32.vlgmr.msra.gmra.mxu1 %vm2375_vm15, %v2355_v49  ;;  %v3372_v22 = vpop.f32.mrf.mxu1  ;;  %v2481_v57 = vrot.slane %v2480_v3, 4  ;;  %3389 = vmatprep.subr.mxu1 %v3514_v0 }
 0xefc   :  { %v2463_v7 = vsel %vm2452_vm12, %v2462_v5, 0.0  ;;  %v2488_v23 = vsel %vm2479_vm14, %v2462_v5, 0.0  ;;  %3397 = vmatprep.mubr.msk.f32.mxu1 %vm3515_vm0, %v3514_v0  ;;  %vm2538_vm0 = vcmask 1043456  }
 0xefd   :  { %v2464_v25 = vrot.slane %v2463_v7, 4  ;;  %v2482_v8 = vadd.f32 %v2481_v57, %v2480_v3  ;;  %v2489_v26 = vrot.slane %v2488_v23, 4  ;;  %v2455_v9 = vadd.f32 %v2454_v18, %v2453_v17 }
 0xeff   :  { %v2465_v58 = vadd.f32 %v2464_v25, %v2463_v7  ;;  %v2483_v27 = vrot.slane %v2482_v8, 2  ;;  %v2490_v10 = vadd.f32 %v2489_v26, %v2488_v23  ;;  %v2456_v39 = vrot.slane %v2455_v9, 2 }
 0xf01   :  { %v2466_v53 = vrot.slane %v2465_v58, 2  ;;  %v2484_v41 = vadd.f32 %v2483_v27, %v2482_v8  ;;  %v2491_v43 = vrot.slane %v2490_v10, 2  ;;  %v2457_v46 = vadd.f32 %v2456_v39, %v2455_v9 }
 0xf03   :  { %v2485_v47 = vrot.slane %v2484_v41, 1  ;;  %v2492_v48 = vadd.f32 %v2491_v43, %v2490_v10  ;;  %v2458_v50 = vrot.slane %v2457_v46, 1  ;;  %v2467_v52 = vadd.f32 %v2466_v53, %v2465_v58 }
 0xf05   :  { %v2486_v54 = vadd.f32 %v2485_v47, %v2484_v41  ;;  %v2493_v51 = vrot.slane %v2492_v48, 1  ;;  %v2459_v40 = vadd.f32 %v2458_v50, %v2457_v46  ;;  %v2468_v63 = vrot.slane %v2467_v52, 1 }
 0xf07   :  { %v2487_v56 = vmul.f32 0.5, %v2486_v54  ;;  %v2494_v59 = vadd.f32 %v2493_v51, %v2492_v48  ;;  %v2461_v19 = vmul.f32 0.5, %v2459_v40  ;;  %v2469_v44 = vadd.f32 %v2468_v63, %v2467_v52  ;;  %v2716_v51 = vld [vmem:[#allocation2 + $0x160] sm:$0xff]  ;;  %v2715_v40 = vld [vmem:[#allocation2 + $0x158] sm:$0xff]  ;;  %v2714_v63 = vld [vmem:[#allocation2 + $0x150] sm:$0xff] }
 0xf08   :  { %3390 = vmatpush3.msra.mxu1 %v2716_v51 }
 0xf09   :  { %v2495_v20 = vmul.f32 0.5, %v2494_v59  ;;  %v2496_v45 = vmul.f32 %v2487_v56, %v2487_v56  ;;  %v2470_v60 = vmul.f32 0.5, %v2469_v44  ;;  %v2471_v21 = vmul.f32 %v2461_v19, %v2461_v19  ;;  %3391 = vmatprep.subr.mxu1 %v3514_v0  ;;  %v2903_v59 = vld [vmem:[#allocation2 + $0x1a0] ss:$0 sm:$0xff] }
 0xf0a   :  { %v2499_v2 = vsub.f32 %v2335_v29, %v2487_v56  ;;  %v2474_v28 = vsub.f32 %v2335_v29, %v2461_v19  ;;  %3392 = vmatpush3.msra.mxu1 %v2715_v40  ;;  %v2713_v56 = vld [vmem:[#allocation2 + $0x148] sm:$0xff] }
 0xf0b   :  { %v2497_v42 = vsub.f32 %v2495_v20, %v2496_v45  ;;  %v2472_v61 = vsub.f32 %v2470_v60, %v2471_v21  ;;  %3393 = vmatprep.subr.mxu1 %v3514_v0 }
 0xf0c   :  { %3394 = vmatpush3.msra.mxu1 %v2714_v63 }
 0xf0d   :  { %v2498_v62 = vmax.f32 %v2497_v42, 0.0  ;;  %v2473_v6 = vmax.f32 %v2472_v61, 0.0  ;;  %3395 = vmatprep.subr.mxu1 %v3514_v0 }
 0xf0e   :  { %3396 = vmatpush3.msra.mxu1 %v2713_v56 }
 0xf0f   :  { %v2500_v11 = vadd.f32 1e-05, %v2498_v62  ;;  %v2475_v12 = vadd.f32 1e-05, %v2473_v6 }
 0xf11   :  { %3472 = vrsqrt.f32 %v2500_v11 }
 0xf12   :  { %3474 = vrsqrt.f32 %v2475_v12 }
 0xf1e   :  { %v3473_v4 = vpop.eup %3472 }
 0xf1f   :  { %v3475_v30 = vpop.eup %3474  ;;  %v2502_v31 = vmul.f32 %v3473_v4, %v2499_v2 }
 0xf20   :  { %v2477_v32 = vmul.f32 %v3475_v30, %v2474_v28 }
 0xf21   :  { %v2503_v33 = vadd.f32 0.0001, %v2502_v31 }
 0xf22   :  { %v2478_v48 = vadd.f32 0.0001, %v2477_v32 }
 0xf23   :  { %v2530_v34 = vrot.slane %v2503_v33, 6 }
 0xf25   :  { %2531 = vrot.lane.b32.xlu0 %v2530_v34, %s3523_s0 }
 0xf6c   :  { %v2373_v14 = vpop.permute.xlu0 %2372 }
 0xf97   :  { %v2532_v46 = vpop.permute.xlu0 %2531 }
 0xf98   :  { %v2537_v52 = vsel %vm2379_vm13, %v2478_v48, %v2532_v46 }
 0xfbb   :  { %v2448_v16 = vpop.f32.mrf.mxu1 }
 0xfbc   :  { %v2449_v15 = vadd.f32 %v2448_v16, %v2373_v14 }
 0xfbd   :  { %v3377_v55 = vpop.f32.mrf.mxu1 }
 0xfbe   :  { %v2504_v24 = vsel %vm2452_vm12, %v2449_v15, 0.0  ;;  %v2512_v1 = vmul.f32 %v2449_v15, %v2449_v15 }
 0xfbf   :  { %v2505_v38 = vrot.slane %v2504_v24, 4 }
 0xfc0   :  { %v2513_v49 = vsel %vm2452_vm12, %v2512_v1, 0.0 }
 0xfc1   :  { %v2506_v29 = vadd.f32 %v2505_v38, %v2504_v24  ;;  %v2514_v17 = vrot.slane %v2513_v49, 4 }
 0xfc3   :  { %v2507_v5 = vrot.slane %v2506_v29, 2  ;;  %v2515_v3 = vadd.f32 %v2514_v17, %v2513_v49 }
 0xfc5   :  { %v2508_v18 = vadd.f32 %v2507_v5, %v2506_v29  ;;  %v2516_v22 = vrot.slane %v2515_v3, 2 }
 0xfc7   :  { %v2509_v57 = vrot.slane %v2508_v18, 1  ;;  %v2517_v7 = vadd.f32 %v2516_v22, %v2515_v3 }
 0xfc9   :  { %v2510_v23 = vadd.f32 %v2509_v57, %v2508_v18  ;;  %v2518_v25 = vrot.slane %v2517_v7, 1 }
 0xfcb   :  { %v2511_v8 = vmul.f32 0.5, %v2510_v23  ;;  %v2519_v26 = vadd.f32 %v2518_v25, %v2517_v7 }
 0xfcd   :  { %v2520_v9 = vmul.f32 0.5, %v2519_v26  ;;  %v2521_v58 = vmul.f32 %v2511_v8, %v2511_v8  ;;  %v2524_v53 = vsub.f32 %v2449_v15, %v2511_v8 }
 0xfcf   :  { %v2522_v27 = vsub.f32 %v2520_v9, %v2521_v58 }
 0xfd1   :  { %v2523_v10 = vmax.f32 %v2522_v27, 0.0 }
 0xfd3   :  { %v2525_v39 = vadd.f32 1e-05, %v2523_v10 }
 0xfd5   :  { %3476 = vrsqrt.f32 %v2525_v39 }
 0xfe2   :  { %v3477_v41 = vpop.eup %3476 }
 0xfe3   :  { %v2527_v43 = vmul.f32 %v3477_v41, %v2524_v53 }
 0xfe5   :  { %v2528_v47 = vadd.f32 0.0001, %v2527_v43 }
 0xfe7   :  { %v2535_v50 = vrot.slane %v2528_v47, 4 }
 0xfe9   :  { %v2539_v54 = vsel %vm2538_vm0, %v2537_v52, %v2535_v50 }
 0xfea   :  { %3387 = vmatmul.mubr.msk.f32.vlgmr.msra.gmra.mxu0 %vm457_vm7, %v2539_v54 }
0x10aa   :  { %v2618_v19 = vpop.f32.mrf.mxu0 }
0x10ab   :  { %v2619_v44 = vadd.f32 %v2903_v59, %v2618_v19 }
0x10ac   :  { %v3388_v20 = vpop.f32.mrf.mxu0 }
0x10ad   :  { %2623 = vrot.lane.b32.xlu0 %v2619_v44, %s3523_s0 }
0x111f   :  { %v2624_v45 = vpop.permute.xlu0 %2623 }
0x1120   :  { %v2626_v60 = vsel %vm2538_vm0, %v2619_v44, %v2624_v45 }
0x1121   :  { %v4072_v21 = vmax.f32 %v2626_v60, 0.0 }
0x1123   :  { %v2636_v42 = vmul.f32 %v4072_v21, %v4072_v21  ;;  %v2628_v61 = vsel %vm2452_vm12, %v4072_v21, 0.0  ;;  %v2654_v62 = vrot.slane %v4072_v21, 2  ;;  %v2683_v0 = vrot.slane %v4072_v21, 4 }
0x1124   :  { %v2629_v6 = vrot.slane %v2628_v61, 4 }
0x1125   :  { %v2637_v11 = vsel %vm2452_vm12, %v2636_v42, 0.0  ;;  %v2656_v12 = vsel %vm2452_vm12, %v2654_v62, 0.0  ;;  %v2665_v2 = vrot.slane %v2636_v42, 2  ;;  %v2685_v4 = vsel %vm2452_vm12, %v2683_v0, 0.0 }
0x1126   :  { %v2630_v28 = vadd.f32 %v2629_v6, %v2628_v61  ;;  %v2638_v30 = vrot.slane %v2637_v11, 4  ;;  %v2657_v31 = vrot.slane %v2656_v12, 4  ;;  %v2686_v32 = vrot.slane %v2685_v4, 4 }
0x1127   :  { %v2667_v33 = vsel %vm2452_vm12, %v2665_v2, 0.0  ;;  %v2693_v34 = vrot.slane %v2636_v42, 4 }
0x1128   :  { %v2631_v36 = vrot.slane %v2630_v28, 2  ;;  %v2639_v37 = vadd.f32 %v2638_v30, %v2637_v11  ;;  %v2658_v13 = vadd.f32 %v2657_v31, %v2656_v12  ;;  %v2668_v35 = vrot.slane %v2667_v33, 4 }
0x1129   :  { %v2687_v14 = vadd.f32 %v2686_v32, %v2685_v4  ;;  %v2695_v16 = vsel %vm2452_vm12, %v2693_v34, 0.0 }
0x112a   :  { %v2632_v15 = vadd.f32 %v2631_v36, %v2630_v28  ;;  %v2640_v55 = vrot.slane %v2639_v37, 2  ;;  %v2659_v24 = vrot.slane %v2658_v13, 2  ;;  %v2669_v1 = vadd.f32 %v2668_v35, %v2667_v33 }
0x112b   :  { %v2688_v38 = vrot.slane %v2687_v14, 2  ;;  %v2696_v49 = vrot.slane %v2695_v16, 4 }
0x112c   :  { %v2633_v29 = vrot.slane %v2632_v15, 1  ;;  %v2641_v17 = vadd.f32 %v2640_v55, %v2639_v37  ;;  %v2660_v5 = vadd.f32 %v2659_v24, %v2658_v13  ;;  %v2670_v3 = vrot.slane %v2669_v1, 2  ;;  %v2905_v37 = vld [vmem:[#allocation2 + $0x1a8] ss:$0 sm:$0xff] }
0x112d   :  { %v2689_v18 = vadd.f32 %v2688_v38, %v2687_v14  ;;  %v2697_v22 = vadd.f32 %v2696_v49, %v2695_v16 }
0x112e   :  { %v2634_v57 = vadd.f32 %v2633_v29, %v2632_v15  ;;  %v2642_v7 = vrot.slane %v2641_v17, 1  ;;  %v2661_v23 = vrot.slane %v2660_v5, 1  ;;  %v2671_v25 = vadd.f32 %v2670_v3, %v2669_v1 }
0x112f   :  { %v2690_v8 = vrot.slane %v2689_v18, 1  ;;  %v2698_v26 = vrot.slane %v2697_v22, 2 }
0x1130   :  { %v2635_v9 = vmul.f32 0.5, %v2634_v57  ;;  %v2643_v58 = vadd.f32 %v2642_v7, %v2641_v17  ;;  %v2662_v27 = vadd.f32 %v2661_v23, %v2660_v5  ;;  %v2672_v10 = vrot.slane %v2671_v25, 1 }
0x1131   :  { %v2691_v39 = vadd.f32 %v2690_v8, %v2689_v18  ;;  %v2699_v53 = vadd.f32 %v2698_v26, %v2697_v22 }
0x1132   :  { %v2644_v41 = vmul.f32 0.5, %v2643_v58  ;;  %v2645_v43 = vmul.f32 %v2635_v9, %v2635_v9  ;;  %v2663_v46 = vmul.f32 0.5, %v2662_v27  ;;  %v2673_v47 = vadd.f32 %v2672_v10, %v2671_v25 }
0x1133   :  { %v2692_v48 = vmul.f32 0.5, %v2691_v39  ;;  %v2700_v50 = vrot.slane %v2699_v53, 1  ;;  %v2648_v0 = vsub.f32 %v4072_v21, %v2635_v9 }
0x1134   :  { %v2646_v52 = vsub.f32 %v2644_v41, %v2645_v43  ;;  %v2675_v54 = vmul.f32 %v2663_v46, %v2663_v46  ;;  %v2674_v51 = vmul.f32 0.5, %v2673_v47  ;;  %v2678_v11 = vsub.f32 %v4072_v21, %v2663_v46 }
0x1135   :  { %v2701_v40 = vadd.f32 %v2700_v50, %v2699_v53  ;;  %v2703_v63 = vmul.f32 %v2692_v48, %v2692_v48  ;;  %v2706_v4 = vsub.f32 %v4072_v21, %v2692_v48 }
0x1136   :  { %v2647_v56 = vmax.f32 %v2646_v52, 0.0  ;;  %v2676_v59 = vsub.f32 %v2674_v51, %v2675_v54 }
0x1137   :  { %v2702_v19 = vmul.f32 0.5, %v2701_v40 }
0x1138   :  { %v2649_v44 = vadd.f32 1e-05, %v2647_v56  ;;  %v2677_v20 = vmax.f32 %v2676_v59, 0.0 }
0x1139   :  { %v2704_v45 = vsub.f32 %v2702_v19, %v2703_v63 }
0x113a   :  { %3478 = vrsqrt.f32 %v2649_v44  ;;  %v2679_v60 = vadd.f32 1e-05, %v2677_v20 }
0x113b   :  { %v2705_v42 = vmax.f32 %v2704_v45, 0.0 }
0x113c   :  { %3480 = vrsqrt.f32 %v2679_v60 }
0x113d   :  { %v2707_v61 = vadd.f32 1e-05, %v2705_v42 }
0x113f   :  { %3482 = vrsqrt.f32 %v2707_v61 }
0x1147   :  { %v3479_v62 = vpop.eup %3478 }
0x1148   :  { %v2651_v6 = vmul.f32 %v3479_v62, %v2648_v0 }
0x1149   :  { %v3481_v12 = vpop.eup %3480 }
0x114a   :  { %v2681_v2 = vmul.f32 %v3481_v12, %v2678_v11  ;;  %v2652_v30 = vadd.f32 0.0001, %v2651_v6 }
0x114c   :  { %v3483_v28 = vpop.eup %3482  ;;  %v2682_v31 = vadd.f32 0.0001, %v2681_v2 }
0x114d   :  { %v2709_v32 = vmul.f32 %v3483_v28, %v2706_v4 }
0x114e   :  { %v2711_v34 = vsel %vm2379_vm13, %v2652_v30, %v2682_v31 }
0x114f   :  { %v2710_v33 = vadd.f32 0.0001, %v2709_v32 }
0x1151   :  { %v2712_v36 = vsel %vm2538_vm0, %v2711_v34, %v2710_v33 }
0x1152   :  { %3398 = vmatmul.mubr.msk.f32.vlgmr.msra.gmra.mxu1 %vm457_vm7, %v2712_v36 }
0x1212   :  { %v2791_v13 = vpop.f32.mrf.mxu1 }
0x1213   :  { %v2792_v35 = vadd.f32 %v2905_v37, %v2791_v13 }
0x1214   :  { %v3399_v14 = vpop.f32.mrf.mxu1 }
0x1215   :  { %2796 = vrot.lane.b32.xlu0 %v2792_v35, %s3524_s5 }
0x1287   :  { %v2797_v16 = vpop.permute.xlu0 %2796 }
0x1288   :  { %v2799_v21 = vsel %vm2538_vm0, %v2792_v35, %v2797_v16 }
0x1289   :  { %v2801_v15 = vsel %vm2800_vm1, %v2799_v21, -inf }
0x128a   :  { %2802 = vmax.xlane.f32.xlu0 %v2801_v15 }
0x1313   :  { %v2803_v55 = vpop.xlane.xlu0 %2802 }
0x1314   :  { %v2804_v24 = vsub.f32 %v2799_v21, %v2803_v55 }
0x1316   :  { %v2805_v1 = vmul.f32 1.442695, %v2804_v24 }
0x1318   :  { %3484 = vpow2.f32 %v2805_v1 }
0x1325   :  { %v3485_v38 = vpop.eup %3484 }
0x1326   :  { %v2807_v49 = vsel %vm2800_vm1, %v3485_v38, 0.0 }
0x1327   :  { %2808 = vadd.xlane.f32.xlu1 %v2807_v49 }
0x13b0   :  { %v2809_v29 = vpop.xlane.xlu1 %2808 }
0x13b1   :  { %3486 = vlog2.f32 %v2809_v29 }
0x13be   :  { %v3487_v17 = vpop.eup %3486 }
0x13bf   :  { %v2811_v5 = vmul.f32 0.6931472, %v3487_v17 }
0x13c1   :  { %v2812_v3 = vsub.f32 %v2804_v24, %v2811_v5 }
0x13c3   :  { %2813 = vst.msk [vmem:[%s4101_s3] sm:$0x3f] %vm2800_vm1, %v2812_v3 }
0x13c4   :  { %2818 = vsyncpa [#allocation3], 1 }

</bundles_post_ra>
